<compile_context>
chip_gen: v7x
topology: tpu7x:2x2x1
jax: 0.10.0
libtpu: 0.0.40
codegen_flags: <defaults>
</compile_context>

<pallas_src>
import math
import numpy as np

import jax
import jax.numpy as jnp
from jax.experimental import pallas as pl
from jax.experimental.pallas import tpu as pltpu


# ----------------------------------------------------------------------------
# Fused per-step decode kernel
# ----------------------------------------------------------------------------
def _decode_step_kernel(
    ptr_ref,                       # SMEM (B,) int32: current node of each sample
    st_ref,                        # (M, C)   f32  static tokens   (M = B*N)
    dyn_ref,                       # (M, D)   f32  dynamic tokens
    mask_ref,                      # (M, 1)   f32  feasibility mask (flattened (B,N))
    h_ref,                         # (B, H)   f32  previous GRU hidden
    w_st_ref, b_st_ref,            # (C, H) f32, (1, H) f32   static encoder
    w_dy_ref, b_dy_ref,            # (D, H) f32, (1, H) f32   dynamic encoder
    w_de_ref, b_de_ref,            # (C, H) f32, (1, H) f32   decoder encoder
    w_ih_ref, w_hh_ref,            # (H, 3H) bf16             GRU (pre-transposed)
    b_ih_ref, b_hh_ref,            # (1, 3H) f32
    was_ref, wad_ref, war_ref,     # (H, H) bf16              attention W (split, transposed)
    va_ref,                        # (1, H) f32
    wps_ref, wpc_ref,              # (H, H) bf16              pointer W (split, transposed)
    vp_ref,                        # (1, H) f32
    action_ref, logp_ref, hnew_ref,  # out: (B,1) f32, (B,1) f32, (B,H) f32
):
    B, H = h_ref.shape
    M = st_ref.shape[0]
    N = M // B
    f32 = jnp.float32
    bf16 = jnp.bfloat16

    st = st_ref[...]               # (M, C)
    dyn = dyn_ref[...]             # (M, D)

    def conv1x1(tok, w_ref, b_ref):
        # 1x1 Conv1d == per-token linear. Contraction dim is 2, so do it with
        # VPU broadcast FMAs instead of wasting the MXU.
        out = b_ref[...]                                   # (1, H) broadcasts
        for c in range(tok.shape[1]):
            out = out + tok[:, c:c + 1] * w_ref[c:c + 1, :]
        return out                                         # (M, H)

    S = conv1x1(st, w_st_ref, b_st_ref)        # static_hidden   (M, H)
    D = conv1x1(dyn, w_dy_ref, b_dy_ref)       # dynamic_hidden  (M, H)
    Sdec = conv1x1(st, w_de_ref, b_de_ref)     # decoder embedding of every node

    row = jax.lax.broadcasted_iota(jnp.int32, (M, 1), 0)   # global token index

    # ---- gather decoder input = embedding of each sample's current node ----
    x_rows = []
    for b in range(B):
        sel = (row == (ptr_ref[b] + b * N)).astype(f32)                 # (M,1) one-hot
        x_rows.append(jnp.sum(sel * Sdec, axis=0, keepdims=True))        # (1,H)
    X = jnp.concatenate(x_rows, axis=0)                                   # (B,H)

    # ---- single-step GRU (PyTorch gate order r, z, n) ----
    h_prev = h_ref[...]                                                   # (B,H)
    gi = jnp.dot(X.astype(bf16), w_ih_ref[...],
                 preferred_element_type=f32) + b_ih_ref[...]              # (B,3H)
    gh = jnp.dot(h_prev.astype(bf16), w_hh_ref[...],
                 preferred_element_type=f32) + b_hh_ref[...]              # (B,3H)
    r = jax.nn.sigmoid(gi[:, 0:H] + gh[:, 0:H])
    z = jax.nn.sigmoid(gi[:, H:2 * H] + gh[:, H:2 * H])
    n_g = jnp.tanh(gi[:, 2 * H:3 * H] + r * gh[:, 2 * H:3 * H])
    h_new = (1.0 - z) * n_g + z * h_prev                                  # (B,H)
    hnew_ref[...] = h_new

    # ---- attention over nodes: softmax_N( v_a . tanh(W_a [S; D; rnn]) ) ----
    S_bf = S.astype(bf16)
    pre = (jnp.dot(S_bf, was_ref[...], preferred_element_type=f32)
           + jnp.dot(D.astype(bf16), wad_ref[...], preferred_element_type=f32))
    t = jnp.dot(h_new.astype(bf16), war_ref[...], preferred_element_type=f32)  # (B,H)
    for b in range(B):
        seg = ((row >= b * N) & (row < (b + 1) * N)).astype(f32)          # (M,1)
        pre = pre + seg * t[b:b + 1, :]
    att_logit = jnp.sum(va_ref[...] * jnp.tanh(pre), axis=1, keepdims=True)  # (M,1)

    # per-sample softmax over its N nodes + attention context (B,H)
    ctx_rows = []
    for b in range(B):
        seg = ((row >= b * N) & (row < (b + 1) * N)).astype(f32)
        lb = jnp.where(seg > 0, att_logit, -1e30)
        mb = jnp.max(lb, keepdims=True)
        eb = jnp.exp(lb - mb)                          # zero outside this sample
        ab = eb * pl.reciprocal(jnp.sum(eb, keepdims=True), approx=True)
        ctx_rows.append(jnp.sum(ab * S, axis=0, keepdims=True))            # (1,H)
    ctx = jnp.concatenate(ctx_rows, axis=0)                                 # (B,H)

    # ---- pointer scores: v_p . tanh(W_p [S; context]) ----
    cproj = jnp.dot(ctx.astype(bf16), wpc_ref[...], preferred_element_type=f32)  # (B,H)
    energy = jnp.dot(S_bf, wps_ref[...], preferred_element_type=f32)             # (M,H)
    for b in range(B):
        seg = ((row >= b * N) & (row < (b + 1) * N)).astype(f32)
        energy = energy + seg * cproj[b:b + 1, :]
    p_logit = jnp.sum(vp_ref[...] * jnp.tanh(energy), axis=1, keepdims=True)      # (M,1)

    # ---- masked softmax + greedy argmax / logp (eval decode path) ----
    mask = mask_ref[...]                                                    # (M,1)
    row_f = row.astype(f32)
    act_rows, logp_rows = [], []
    for b in range(B):
        seg = ((row >= b * N) & (row < (b + 1) * N)).astype(f32)
        valid = seg * mask
        lb = jnp.where(valid > 0, p_logit, -1e30)
        mb = jnp.max(lb, keepdims=True)
        eb = jnp.exp(lb - mb)
        pb = eb * pl.reciprocal(jnp.sum(eb, keepdims=True), approx=True)    # (M,1)
        pmax = jnp.max(pb, keepdims=True)                                   # (1,1)
        # first index achieving the max (torch.max tie-breaking)
        cand = jnp.where(pb >= pmax, row_f, float(M))
        gidx = jnp.min(cand, keepdims=True)                                 # (1,1)
        act_rows.append(gidx - float(b * N))                                # local node id
        logp_rows.append(jnp.log(pmax))
    action_ref[...] = jnp.concatenate(act_rows, axis=0)                     # (B,1)
    logp_ref[...] = jnp.concatenate(logp_rows, axis=0)                      # (B,1)


def _decode_step_impl(ptr, static_tok, dyn_tok, mask_col, last_hh, params):
    B, H = last_hh.shape
    weights = (
        params["w_static_t"], params["b_static"],
        params["w_dynamic_t"], params["b_dynamic"],
        params["w_decoder_t"], params["b_decoder"],
        params["w_ih_t"], params["w_hh_t"], params["b_ih"], params["b_hh"],
        params["w_a_s_t"], params["w_a_d_t"], params["w_a_r_t"], params["v_a"],
        params["w_p_s_t"], params["w_p_c_t"], params["v_p"],
    )
    vmem = pl.BlockSpec(memory_space=pltpu.MemorySpace.VMEM)
    smem = pl.BlockSpec(memory_space=pltpu.MemorySpace.SMEM)
    return pl.pallas_call(
        _decode_step_kernel,
        out_shape=(
            jax.ShapeDtypeStruct((B, 1), jnp.float32),   # greedy action (as float)
            jax.ShapeDtypeStruct((B, 1), jnp.float32),   # log prob of the action
            jax.ShapeDtypeStruct((B, H), jnp.float32),   # new GRU hidden
        ),
        in_specs=[smem, vmem, vmem, vmem, vmem] + [vmem] * len(weights),
        out_specs=(vmem, vmem, vmem),
    )(ptr, static_tok, dyn_tok, mask_col, last_hh, *weights)


decode_step = jax.jit(_decode_step_impl)


# ----------------------------------------------------------------------------
# Default (surrogate) problem callbacks.
# TODO(synk): the real update_fn / mask_fn / node_distance_fn are external to
# the module (time-window logic, est_upper/est_lower over/under-estimation);
# deterministic VRP-style numpy surrogates are used here instead.
# ----------------------------------------------------------------------------
def _default_node_distance_fn(static, depot_num):
    coords = np.asarray(static)                              # (B, 2, N)
    diff = coords[:, :, :, None] - coords[:, :, None, :]     # (B, 2, N, N)
    return np.sqrt((diff ** 2).sum(axis=1))                  # (B, N, N)


def _default_mask_fn(depot_num, dynamic, distance, ptr, car_id, est_upper):
    B, _, N = dynamic.shape
    mask = np.zeros((B, N), dtype=np.float32)
    for b in range(B):
        load = dynamic[b, 0, 0]
        demand = dynamic[b, 1, :]
        p = int(ptr[b])
        for j in range(depot_num, N):
            if demand[j] > 1e-9 and demand[j] <= load + 1e-9:
                mask[b, j] = 1.0
        if p >= depot_num:  # currently at a customer -> may return to any depot
            mask[b, :depot_num] = 1.0
    return mask


def _default_update_fn(depot_num, car_load, dynamic, distance, action, ptr,
                       est_upper, est_lower):
    B, _, N = dynamic.shape
    next_dis = np.zeros((B,), dtype=np.float32)
    for b in range(B):
        a = int(action[b])
        p = int(ptr[b])
        next_dis[b] = distance[b, p, a]
        load = dynamic[b, 0, 0]
        if a < depot_num:
            load = car_load            # refill at depot
        else:
            load = load - dynamic[b, 1, a]
            dynamic[b, 1, a] = 0.0     # demand served
        dynamic[b, 0, :] = load
    return dynamic, next_dis


# ----------------------------------------------------------------------------
# DRL4TSP (forward only) with Pallas compute
# ----------------------------------------------------------------------------
class DRL4TSPPallas:
    def __init__(self, static_size, dynamic_size, hidden_size, car_load, depot_num,
                 update_fn=None, mask_fn=None, node_distance_fn=None,
                 num_layers=1, dropout=0.0, est_upper=1.1, est_lower=0.9, key=None):
        if dynamic_size < 1:
            raise ValueError(":param dynamic_size: must be > 0")
        assert num_layers == 1
        self.update_fn = update_fn
        self.mask_fn = mask_fn
        self.node_distance_fn = node_distance_fn
        self.car_load = car_load
        self.depot_num = depot_num
        self.est_upper = est_upper
        self.est_lower = est_lower
        self.hidden_size = hidden_size
        self.training = False  # TODO(synk): training-mode Categorical sampling w/ rejection loop not implemented; greedy (eval) decode only.

        H = hidden_size
        key = jax.random.PRNGKey(0) if key is None else key
        ks = jax.random.split(key, 10)

        def xavier(k, shape):
            limit = math.sqrt(6.0 / (shape[-1] + shape[-2]))
            return jax.random.uniform(k, shape, jnp.float32, -limit, limit)

        bf16 = jnp.bfloat16
        # 1x1 Conv1d encoders (torch weight (H, C)); stored transposed for row layout
        w_static = xavier(ks[0], (H, static_size))
        w_dynamic = xavier(ks[1], (H, dynamic_size))
        w_dec = xavier(ks[2], (H, static_size))
        # GRU(H,H), Attention(W (H,3H), v (1,H)), pointer(W (H,2H), v (1,H))
        w_a = xavier(ks[3], (H, 3 * H))
        w_p = xavier(ks[4], (H, 2 * H))
        w_ih = xavier(ks[5], (3 * H, H))
        w_hh = xavier(ks[6], (3 * H, H))

        self.params = dict(
            w_static_t=w_static.T, b_static=jnp.zeros((1, H), jnp.float32),
            w_dynamic_t=w_dynamic.T, b_dynamic=jnp.zeros((1, H), jnp.float32),
            w_decoder_t=w_dec.T, b_decoder=jnp.zeros((1, H), jnp.float32),
            w_ih_t=w_ih.T.astype(bf16), w_hh_t=w_hh.T.astype(bf16),
            b_ih=jnp.zeros((1, 3 * H), jnp.float32),
            b_hh=jnp.zeros((1, 3 * H), jnp.float32),
            w_a_s_t=w_a[:, 0:H].T.astype(bf16),
            w_a_d_t=w_a[:, H:2 * H].T.astype(bf16),
            w_a_r_t=w_a[:, 2 * H:3 * H].T.astype(bf16),
            v_a=xavier(ks[7], (1, H)),
            w_p_s_t=w_p[:, 0:H].T.astype(bf16),
            w_p_c_t=w_p[:, H:2 * H].T.astype(bf16),
            v_p=xavier(ks[8], (1, H)),
        )

    # --- bookkeeping helpers (host-side, mirrors the torch code) ---
    def get_init_order(self, batch_size, car_num):
        return [[(i, 0.0) for i in range(car_num)] for _ in range(batch_size)]

    def get_next_car_id(self, task_complete_order):
        return [order[0][0] for order in task_complete_order]

    def update_task_complete_order(self, order, next_point_dis):
        for sample, dis in zip(order, next_point_dis):
            next_car = sample.pop(0)
            sample.append((next_car[0], next_car[1] + float(dis)))
            sample.sort(key=lambda tup: tup[1])
        return order

    # --- forward ---
    def forward(self, static, dynamic, decoder_input=None, last_hh=None):
        B, input_size, N = static.shape
        H = self.hidden_size
        distance = self.node_distance_fn(static, self.depot_num)
        if decoder_input is None:
            raise ValueError("DRL4TSP decoder input is None!")
        # NOTE: like the reference module, decoder_input is only validated; the
        # decoder is fed the embedding of the current pointer position each step.

        M = B * N
        static_tok = jnp.transpose(static, (0, 2, 1)).reshape(M, input_size)
        static_tok = static_tok.astype(jnp.float32)

        car_seq_order = self.get_init_order(B, self.depot_num)
        car_id_tw = self.get_next_car_id(car_seq_order)
        car_load_tw = [[self.car_load] * self.depot_num for _ in range(B)]
        tour_idx_tw = [[[i] for i in range(self.depot_num)] for _ in range(B)]
        tour_logp = []
        last_hh_home = np.zeros((B, self.depot_num, H), np.float32)
        max_steps = N if self.mask_fn is None else 2 * N

        dyn = np.array(dynamic, dtype=np.float32)        # host copy (B, Dsz, N)
        arange_b = np.arange(B)

        for step in range(max_steps):
            ptr = np.array(
                [tour_idx_tw[b][car_id_tw[b]][-1] for b in range(B)], dtype=np.int32
            )
            mask = self.mask_fn(self.depot_num, dyn, distance, ptr, car_id_tw,
                                self.est_upper)
            if not mask.any():
                break
            # finished rows stay in place (avoids NaN softmax; logp zeroed by is_done)
            for b in range(B):
                if mask[b].sum() == 0:
                    mask[b, ptr[b]] = 1.0

            dyn_tok = np.ascontiguousarray(dyn.transpose(0, 2, 1)).reshape(M, -1)
            mask_col = np.ascontiguousarray(mask.astype(np.float32)).reshape(M, 1)
            hh = last_hh_home[arange_b, car_id_tw]                          # (B, H)

            action_f, logp_f, new_hh = decode_step(
                jnp.asarray(ptr), static_tok, jnp.asarray(dyn_tok),
                jnp.asarray(mask_col), jnp.asarray(hh), self.params,
            )
            action = np.rint(np.asarray(action_f)[:, 0]).astype(np.int64)
            logp = np.asarray(logp_f)[:, 0]
            new_hh = np.asarray(new_hh)

            last_hh_home[arange_b, car_id_tw] = new_hh

            dyn, next_dis = self.update_fn(
                self.depot_num, self.car_load, dyn, distance, action, ptr,
                self.est_upper, self.est_lower
            )
            for b in range(B):
                car_load_tw[b][car_id_tw[b]] = float(dyn[b, 0, 0])
            is_done = (dyn[:, 1, :].sum(axis=1) <= 1e-9).astype(np.float32)
            logp = logp * (1.0 - is_done)
            self.update_task_complete_order(car_seq_order, next_dis)
            next_car_id = self.get_next_car_id(car_seq_order)
            for b in range(B):
                dyn[b, 0, :] = car_load_tw[b][next_car_id[b]]

            tour_logp.append(logp[:, None])
            for b in range(B):
                tour_idx_tw[b][car_id_tw[b]].append(int(action[b]))
            car_id_tw = next_car_id
        else:
            # reached max_steps without break (mirrors the torch for-else branch)
            pass

        if (dyn[:, 1, :] > 1e-9).any():
            raise ValueError("demands remain unserved")

        tour_logp = jnp.asarray(np.concatenate(tour_logp, axis=1))
        tour_per_uav = []
        for i in range(self.depot_num):
            uav_tour = [list(tour_idx_tw[b][i]) for b in range(B)]
            max_len = max(len(t) for t in uav_tour)
            for t in uav_tour:
                t += (max_len - len(t)) * t[-1:]
            tour_per_uav.append(jnp.asarray(np.array(uav_tour, dtype=np.int64)))
        return tour_per_uav, tour_logp


# ----------------------------------------------------------------------------
if __name__ == "__main__":
    B, STATIC_SIZE, DYNAMIC_SIZE = 2, 2, 2
    HIDDEN = 128          # matches the hard-coded torch.zeros(128) hidden homes
    DEPOT_NUM, N = 2, 10  # 2 depots + 8 customers
    CAR_LOAD = 1.0

    key = jax.random.PRNGKey(0)
    k_params, k_static, k_demand = jax.random.split(key, 3)

    static = jax.random.uniform(k_static, (B, STATIC_SIZE, N), jnp.float32)
    demand = jax.random.uniform(k_demand, (B, N), jnp.float32) * 0.25 + 0.05
    demand = demand.at[:, :DEPOT_NUM].set(0.0)
    dynamic = jnp.stack(
        [jnp.full((B, N), CAR_LOAD, jnp.float32), demand], axis=1
    )                                             # (B, 2, N): (load, demand)
    decoder_input = static[:, :, 0]               # (B, num_feats)

    model = DRL4TSPPallas(
        STATIC_SIZE, DYNAMIC_SIZE, HIDDEN, CAR_LOAD, DEPOT_NUM,
        update_fn=_default_update_fn,
        mask_fn=_default_mask_fn,
        node_distance_fn=_default_node_distance_fn,
        num_layers=1, dropout=0.0, est_upper=1.1, est_lower=0.9,
        key=k_params,
    )

    tour_per_uav, tour_logp = model.forward(static, dynamic, decoder_input)
    jax.block_until_ready(tour_logp)
    for t in tour_per_uav:
        jax.block_until_ready(t)
    print("KERNEL_OK")
</pallas_src>

<mosaic_0001>
module attributes {stable_mosaic.version = 11 : i64} {
  func.func @_decode_step_kernel(%arg0: memref<2xi32, #tpu.memory_space<smem>>, %arg1: memref<20x2xf32, #tpu.memory_space<vmem>>, %arg2: memref<20x2xf32, #tpu.memory_space<vmem>>, %arg3: memref<20x1xf32, #tpu.memory_space<vmem>>, %arg4: memref<2x128xf32, #tpu.memory_space<vmem>>, %arg5: memref<2x128xf32, #tpu.memory_space<vmem>>, %arg6: memref<1x128xf32, #tpu.memory_space<vmem>>, %arg7: memref<2x128xf32, #tpu.memory_space<vmem>>, %arg8: memref<1x128xf32, #tpu.memory_space<vmem>>, %arg9: memref<2x128xf32, #tpu.memory_space<vmem>>, %arg10: memref<1x128xf32, #tpu.memory_space<vmem>>, %arg11: memref<128x384xbf16, #tpu.memory_space<vmem>>, %arg12: memref<128x384xbf16, #tpu.memory_space<vmem>>, %arg13: memref<1x384xf32, #tpu.memory_space<vmem>>, %arg14: memref<1x384xf32, #tpu.memory_space<vmem>>, %arg15: memref<128x128xbf16, #tpu.memory_space<vmem>>, %arg16: memref<128x128xbf16, #tpu.memory_space<vmem>>, %arg17: memref<128x128xbf16, #tpu.memory_space<vmem>>, %arg18: memref<1x128xf32, #tpu.memory_space<vmem>>, %arg19: memref<128x128xbf16, #tpu.memory_space<vmem>>, %arg20: memref<128x128xbf16, #tpu.memory_space<vmem>>, %arg21: memref<1x128xf32, #tpu.memory_space<vmem>>, %arg22: memref<2x1xf32, #tpu.memory_space<vmem>>, %arg23: memref<2x1xf32, #tpu.memory_space<vmem>>, %arg24: memref<2x128xf32, #tpu.memory_space<vmem>>) attributes {dimension_semantics = [], scalar_prefetch = 0 : i64, scratch_operands = 0 : i64, tpu.core_type = #tpu.core_type<tc>} {
    %c0 = arith.constant 0 : index
    %c0_0 = arith.constant 0 : index
    %0 = vector.load %arg1[%c0, %c0_0] : memref<20x2xf32, #tpu.memory_space<vmem>>, vector<20x2xf32>
    %c0_1 = arith.constant 0 : index
    %c0_2 = arith.constant 0 : index
    %1 = vector.load %arg2[%c0_1, %c0_2] : memref<20x2xf32, #tpu.memory_space<vmem>>, vector<20x2xf32>
    %c0_3 = arith.constant 0 : index
    %c0_4 = arith.constant 0 : index
    %2 = vector.load %arg6[%c0_3, %c0_4] : memref<1x128xf32, #tpu.memory_space<vmem>>, vector<1x128xf32>
    %3 = vector.extract_strided_slice %0 {offsets = [0, 0], sizes = [20, 1], strides = [1, 1]} : vector<20x2xf32> to vector<20x1xf32>
    %c0_5 = arith.constant 0 : index
    %c0_6 = arith.constant 0 : index
    %4 = vector.load %arg5[%c0_5, %c0_6] : memref<2x128xf32, #tpu.memory_space<vmem>>, vector<1x128xf32>
    %5 = vector.broadcast %3 : vector<20x1xf32> to vector<20x128xf32>
    %6 = vector.broadcast %4 : vector<1x128xf32> to vector<20x128xf32>
    %7 = arith.mulf %5, %6 : vector<20x128xf32>
    %8 = vector.broadcast %2 : vector<1x128xf32> to vector<20x128xf32>
    %9 = arith.addf %8, %7 : vector<20x128xf32>
    %10 = vector.extract_strided_slice %0 {offsets = [0, 1], sizes = [20, 1], strides = [1, 1]} : vector<20x2xf32> to vector<20x1xf32>
    %c1 = arith.constant 1 : index
    %c0_7 = arith.constant 0 : index
    %11 = vector.load %arg5[%c1, %c0_7] : memref<2x128xf32, #tpu.memory_space<vmem>>, vector<1x128xf32>
    %12 = vector.broadcast %10 : vector<20x1xf32> to vector<20x128xf32>
    %13 = vector.broadcast %11 : vector<1x128xf32> to vector<20x128xf32>
    %14 = arith.mulf %12, %13 : vector<20x128xf32>
    %15 = arith.addf %9, %14 : vector<20x128xf32>
    %c0_8 = arith.constant 0 : index
    %c0_9 = arith.constant 0 : index
    %16 = vector.load %arg8[%c0_8, %c0_9] : memref<1x128xf32, #tpu.memory_space<vmem>>, vector<1x128xf32>
    %17 = vector.extract_strided_slice %1 {offsets = [0, 0], sizes = [20, 1], strides = [1, 1]} : vector<20x2xf32> to vector<20x1xf32>
    %c0_10 = arith.constant 0 : index
    %c0_11 = arith.constant 0 : index
    %18 = vector.load %arg7[%c0_10, %c0_11] : memref<2x128xf32, #tpu.memory_space<vmem>>, vector<1x128xf32>
    %19 = vector.broadcast %17 : vector<20x1xf32> to vector<20x128xf32>
    %20 = vector.broadcast %18 : vector<1x128xf32> to vector<20x128xf32>
    %21 = arith.mulf %19, %20 : vector<20x128xf32>
    %22 = vector.broadcast %16 : vector<1x128xf32> to vector<20x128xf32>
    %23 = arith.addf %22, %21 : vector<20x128xf32>
    %24 = vector.extract_strided_slice %1 {offsets = [0, 1], sizes = [20, 1], strides = [1, 1]} : vector<20x2xf32> to vector<20x1xf32>
    %c1_12 = arith.constant 1 : index
    %c0_13 = arith.constant 0 : index
    %25 = vector.load %arg7[%c1_12, %c0_13] : memref<2x128xf32, #tpu.memory_space<vmem>>, vector<1x128xf32>
    %26 = vector.broadcast %24 : vector<20x1xf32> to vector<20x128xf32>
    %27 = vector.broadcast %25 : vector<1x128xf32> to vector<20x128xf32>
    %28 = arith.mulf %26, %27 : vector<20x128xf32>
    %29 = arith.addf %23, %28 : vector<20x128xf32>
    %c0_14 = arith.constant 0 : index
    %c0_15 = arith.constant 0 : index
    %30 = vector.load %arg10[%c0_14, %c0_15] : memref<1x128xf32, #tpu.memory_space<vmem>>, vector<1x128xf32>
    %31 = vector.extract_strided_slice %0 {offsets = [0, 0], sizes = [20, 1], strides = [1, 1]} : vector<20x2xf32> to vector<20x1xf32>
    %c0_16 = arith.constant 0 : index
    %c0_17 = arith.constant 0 : index
    %32 = vector.load %arg9[%c0_16, %c0_17] : memref<2x128xf32, #tpu.memory_space<vmem>>, vector<1x128xf32>
    %33 = vector.broadcast %31 : vector<20x1xf32> to vector<20x128xf32>
    %34 = vector.broadcast %32 : vector<1x128xf32> to vector<20x128xf32>
    %35 = arith.mulf %33, %34 : vector<20x128xf32>
    %36 = vector.broadcast %30 : vector<1x128xf32> to vector<20x128xf32>
    %37 = arith.addf %36, %35 : vector<20x128xf32>
    %38 = vector.extract_strided_slice %0 {offsets = [0, 1], sizes = [20, 1], strides = [1, 1]} : vector<20x2xf32> to vector<20x1xf32>
    %c1_18 = arith.constant 1 : index
    %c0_19 = arith.constant 0 : index
    %39 = vector.load %arg9[%c1_18, %c0_19] : memref<2x128xf32, #tpu.memory_space<vmem>>, vector<1x128xf32>
    %40 = vector.broadcast %38 : vector<20x1xf32> to vector<20x128xf32>
    %41 = vector.broadcast %39 : vector<1x128xf32> to vector<20x128xf32>
    %42 = arith.mulf %40, %41 : vector<20x128xf32>
    %43 = arith.addf %37, %42 : vector<20x128xf32>
    %44 = tpu.iota {dimensions = array<i32: 0>} : vector<20x1xi32>
    %c0_20 = arith.constant 0 : index
    %45 = memref.load %arg0[%c0_20] : memref<2xi32, #tpu.memory_space<smem>>
    %c0_i32 = arith.constant 0 : i32
    %46 = arith.addi %45, %c0_i32 : i32
    %47 = vector.broadcast %46 : i32 to vector<20x1xi32>
    %48 = arith.cmpi eq, %44, %47 : vector<20x1xi32>
    %49 = arith.extui %48 : vector<20x1xi1> to vector<20x1xi32>
    %50 = arith.sitofp %49 : vector<20x1xi32> to vector<20x1xf32>
    %51 = vector.broadcast %50 : vector<20x1xf32> to vector<20x128xf32>
    %52 = arith.mulf %51, %43 : vector<20x128xf32>
    %cst = arith.constant dense<0.000000e+00> : vector<128xf32>
    %53 = vector.multi_reduction <add>, %52, %cst [0] : vector<20x128xf32> to vector<128xf32>
    %54 = vector.shape_cast %53 : vector<128xf32> to vector<1x128xf32>
    %c1_21 = arith.constant 1 : index
    %55 = memref.load %arg0[%c1_21] : memref<2xi32, #tpu.memory_space<smem>>
    %c10_i32 = arith.constant 10 : i32
    %56 = arith.addi %55, %c10_i32 : i32
    %57 = vector.broadcast %56 : i32 to vector<20x1xi32>
    %58 = arith.cmpi eq, %44, %57 : vector<20x1xi32>
    %59 = arith.extui %58 : vector<20x1xi1> to vector<20x1xi32>
    %60 = arith.sitofp %59 : vector<20x1xi32> to vector<20x1xf32>
    %61 = vector.broadcast %60 : vector<20x1xf32> to vector<20x128xf32>
    %62 = arith.mulf %61, %43 : vector<20x128xf32>
    %cst_22 = arith.constant dense<0.000000e+00> : vector<128xf32>
    %63 = vector.multi_reduction <add>, %62, %cst_22 [0] : vector<20x128xf32> to vector<128xf32>
    %64 = vector.shape_cast %63 : vector<128xf32> to vector<1x128xf32>
    %65 = tpu.concatenate %54, %64 in 0 : vector<1x128xf32>, vector<1x128xf32> -> vector<2x128xf32>
    %c0_23 = arith.constant 0 : index
    %c0_24 = arith.constant 0 : index
    %66 = vector.load %arg4[%c0_23, %c0_24] : memref<2x128xf32, #tpu.memory_space<vmem>>, vector<2x128xf32>
    %67 = arith.truncf %65 : vector<2x128xf32> to vector<2x128xbf16>
    %c0_25 = arith.constant 0 : index
    %c0_26 = arith.constant 0 : index
    %68 = vector.load %arg11[%c0_25, %c0_26] : memref<128x384xbf16, #tpu.memory_space<vmem>>, vector<128x384xbf16>
    %cst_27 = arith.constant dense<0.000000e+00> : vector<2x384xf32>
    %69 = tpu.matmul %67, %68, %cst_27 {dimension_numbers = #tpu.dot_dimension_numbers<[1], [0], [0], [1], [0, 0, 1, 1], [], []>} : vector<2x128xbf16>, vector<128x384xbf16>, vector<2x384xf32> -> vector<2x384xf32>
    %c0_28 = arith.constant 0 : index
    %c0_29 = arith.constant 0 : index
    %70 = vector.load %arg13[%c0_28, %c0_29] : memref<1x384xf32, #tpu.memory_space<vmem>>, vector<1x384xf32>
    %71 = vector.broadcast %70 : vector<1x384xf32> to vector<2x384xf32>
    %72 = arith.addf %69, %71 : vector<2x384xf32>
    %73 = arith.truncf %66 : vector<2x128xf32> to vector<2x128xbf16>
    %c0_30 = arith.constant 0 : index
    %c0_31 = arith.constant 0 : index
    %74 = vector.load %arg12[%c0_30, %c0_31] : memref<128x384xbf16, #tpu.memory_space<vmem>>, vector<128x384xbf16>
    %cst_32 = arith.constant dense<0.000000e+00> : vector<2x384xf32>
    %75 = tpu.matmul %73, %74, %cst_32 {dimension_numbers = #tpu.dot_dimension_numbers<[1], [0], [0], [1], [0, 0, 1, 1], [], []>} : vector<2x128xbf16>, vector<128x384xbf16>, vector<2x384xf32> -> vector<2x384xf32>
    %c0_33 = arith.constant 0 : index
    %c0_34 = arith.constant 0 : index
    %76 = vector.load %arg14[%c0_33, %c0_34] : memref<1x384xf32, #tpu.memory_space<vmem>>, vector<1x384xf32>
    %77 = vector.broadcast %76 : vector<1x384xf32> to vector<2x384xf32>
    %78 = arith.addf %75, %77 : vector<2x384xf32>
    %79 = vector.extract_strided_slice %72 {offsets = [0, 0], sizes = [2, 128], strides = [1, 1]} : vector<2x384xf32> to vector<2x128xf32>
    %80 = vector.extract_strided_slice %78 {offsets = [0, 0], sizes = [2, 128], strides = [1, 1]} : vector<2x384xf32> to vector<2x128xf32>
    %81 = arith.addf %79, %80 : vector<2x128xf32>
    %82 = arith.negf %81 : vector<2x128xf32>
    %83 = math.exp %82 : vector<2x128xf32>
    %cst_35 = arith.constant 1.000000e+00 : f32
    %84 = vector.broadcast %cst_35 : f32 to vector<2x128xf32>
    %85 = arith.addf %84, %83 : vector<2x128xf32>
    %86 = arith.divf %84, %85 : vector<2x128xf32>
    %87 = vector.extract_strided_slice %72 {offsets = [0, 128], sizes = [2, 128], strides = [1, 1]} : vector<2x384xf32> to vector<2x128xf32>
    %88 = vector.extract_strided_slice %78 {offsets = [0, 128], sizes = [2, 128], strides = [1, 1]} : vector<2x384xf32> to vector<2x128xf32>
    %89 = arith.addf %87, %88 : vector<2x128xf32>
    %90 = arith.negf %89 : vector<2x128xf32>
    %91 = math.exp %90 : vector<2x128xf32>
    %cst_36 = arith.constant 1.000000e+00 : f32
    %92 = vector.broadcast %cst_36 : f32 to vector<2x128xf32>
    %93 = arith.addf %92, %91 : vector<2x128xf32>
    %94 = arith.divf %92, %93 : vector<2x128xf32>
    %95 = vector.extract_strided_slice %72 {offsets = [0, 256], sizes = [2, 128], strides = [1, 1]} : vector<2x384xf32> to vector<2x128xf32>
    %96 = vector.extract_strided_slice %78 {offsets = [0, 256], sizes = [2, 128], strides = [1, 1]} : vector<2x384xf32> to vector<2x128xf32>
    %97 = arith.mulf %86, %96 : vector<2x128xf32>
    %98 = arith.addf %95, %97 : vector<2x128xf32>
    %99 = math.tanh %98 : vector<2x128xf32>
    %cst_37 = arith.constant 1.000000e+00 : f32
    %100 = vector.broadcast %cst_37 : f32 to vector<2x128xf32>
    %101 = arith.subf %100, %94 : vector<2x128xf32>
    %102 = arith.mulf %101, %99 : vector<2x128xf32>
    %103 = arith.mulf %94, %66 : vector<2x128xf32>
    %104 = arith.addf %102, %103 : vector<2x128xf32>
    %c0_38 = arith.constant 0 : index
    %c0_39 = arith.constant 0 : index
    %105 = vector.load %arg24[%c0_38, %c0_39] : memref<2x128xf32, #tpu.memory_space<vmem>>, vector<2x128xf32>
    tpu.vector_store %arg24[%c0_38, %c0_39], %104 {strides = array<i32>} : memref<2x128xf32, #tpu.memory_space<vmem>>, vector<2x128xf32>,
    %106 = arith.truncf %15 : vector<20x128xf32> to vector<20x128xbf16>
    %c0_40 = arith.constant 0 : index
    %c0_41 = arith.constant 0 : index
    %107 = vector.load %arg15[%c0_40, %c0_41] : memref<128x128xbf16, #tpu.memory_space<vmem>>, vector<128x128xbf16>
    %cst_42 = arith.constant dense<0.000000e+00> : vector<20x128xf32>
    %108 = tpu.matmul %106, %107, %cst_42 {dimension_numbers = #tpu.dot_dimension_numbers<[1], [0], [0], [1], [0, 0, 1, 1], [], []>} : vector<20x128xbf16>, vector<128x128xbf16>, vector<20x128xf32> -> vector<20x128xf32>
    %109 = arith.truncf %29 : vector<20x128xf32> to vector<20x128xbf16>
    %c0_43 = arith.constant 0 : index
    %c0_44 = arith.constant 0 : index
    %110 = vector.load %arg16[%c0_43, %c0_44] : memref<128x128xbf16, #tpu.memory_space<vmem>>, vector<128x128xbf16>
    %cst_45 = arith.constant dense<0.000000e+00> : vector<20x128xf32>
    %111 = tpu.matmul %109, %110, %cst_45 {dimension_numbers = #tpu.dot_dimension_numbers<[1], [0], [0], [1], [0, 0, 1, 1], [], []>} : vector<20x128xbf16>, vector<128x128xbf16>, vector<20x128xf32> -> vector<20x128xf32>
    %112 = arith.addf %108, %111 : vector<20x128xf32>
    %113 = arith.truncf %104 : vector<2x128xf32> to vector<2x128xbf16>
    %c0_46 = arith.constant 0 : index
    %c0_47 = arith.constant 0 : index
    %114 = vector.load %arg17[%c0_46, %c0_47] : memref<128x128xbf16, #tpu.memory_space<vmem>>, vector<128x128xbf16>
    %cst_48 = arith.constant dense<0.000000e+00> : vector<2x128xf32>
    %115 = tpu.matmul %113, %114, %cst_48 {dimension_numbers = #tpu.dot_dimension_numbers<[1], [0], [0], [1], [0, 0, 1, 1], [], []>} : vector<2x128xbf16>, vector<128x128xbf16>, vector<2x128xf32> -> vector<2x128xf32>
    %c0_i32_49 = arith.constant 0 : i32
    %116 = vector.broadcast %c0_i32_49 : i32 to vector<20x1xi32>
    %117 = arith.cmpi sge, %44, %116 : vector<20x1xi32>
    %c10_i32_50 = arith.constant 10 : i32
    %118 = vector.broadcast %c10_i32_50 : i32 to vector<20x1xi32>
    %119 = arith.cmpi slt, %44, %118 : vector<20x1xi32>
    %120 = arith.andi %117, %119 : vector<20x1xi1>
    %121 = arith.extui %120 : vector<20x1xi1> to vector<20x1xi32>
    %122 = arith.sitofp %121 : vector<20x1xi32> to vector<20x1xf32>
    %123 = vector.extract_strided_slice %115 {offsets = [0, 0], sizes = [1, 128], strides = [1, 1]} : vector<2x128xf32> to vector<1x128xf32>
    %124 = vector.broadcast %122 : vector<20x1xf32> to vector<20x128xf32>
    %125 = vector.broadcast %123 : vector<1x128xf32> to vector<20x128xf32>
    %126 = arith.mulf %124, %125 : vector<20x128xf32>
    %127 = arith.addf %112, %126 : vector<20x128xf32>
    %c10_i32_51 = arith.constant 10 : i32
    %128 = vector.broadcast %c10_i32_51 : i32 to vector<20x1xi32>
    %129 = arith.cmpi sge, %44, %128 : vector<20x1xi32>
    %c20_i32 = arith.constant 20 : i32
    %130 = vector.broadcast %c20_i32 : i32 to vector<20x1xi32>
    %131 = arith.cmpi slt, %44, %130 : vector<20x1xi32>
    %132 = arith.andi %129, %131 : vector<20x1xi1>
    %133 = arith.extui %132 : vector<20x1xi1> to vector<20x1xi32>
    %134 = arith.sitofp %133 : vector<20x1xi32> to vector<20x1xf32>
    %135 = vector.extract_strided_slice %115 {offsets = [1, 0], sizes = [1, 128], strides = [1, 1]} : vector<2x128xf32> to vector<1x128xf32>
    %136 = vector.broadcast %134 : vector<20x1xf32> to vector<20x128xf32>
    %137 = vector.broadcast %135 : vector<1x128xf32> to vector<20x128xf32>
    %138 = arith.mulf %136, %137 : vector<20x128xf32>
    %139 = arith.addf %127, %138 : vector<20x128xf32>
    %c0_52 = arith.constant 0 : index
    %c0_53 = arith.constant 0 : index
    %140 = vector.load %arg18[%c0_52, %c0_53] : memref<1x128xf32, #tpu.memory_space<vmem>>, vector<1x128xf32>
    %141 = math.tanh %139 : vector<20x128xf32>
    %142 = vector.broadcast %140 : vector<1x128xf32> to vector<20x128xf32>
    %143 = arith.mulf %142, %141 : vector<20x128xf32>
    %cst_54 = arith.constant dense<0.000000e+00> : vector<20xf32>
    %144 = vector.multi_reduction <add>, %143, %cst_54 [1] : vector<20x128xf32> to vector<20xf32>
    %145 = vector.shape_cast %144 : vector<20xf32> to vector<20x1xf32>
    %c0_i32_55 = arith.constant 0 : i32
    %146 = vector.broadcast %c0_i32_55 : i32 to vector<20x1xi32>
    %147 = arith.cmpi sge, %44, %146 : vector<20x1xi32>
    %c10_i32_56 = arith.constant 10 : i32
    %148 = vector.broadcast %c10_i32_56 : i32 to vector<20x1xi32>
    %149 = arith.cmpi slt, %44, %148 : vector<20x1xi32>
    %150 = arith.andi %147, %149 : vector<20x1xi1>
    %151 = arith.extui %150 : vector<20x1xi1> to vector<20x1xi32>
    %152 = arith.sitofp %151 : vector<20x1xi32> to vector<20x1xf32>
    %cst_57 = arith.constant 0.000000e+00 : f32
    %153 = vector.broadcast %cst_57 : f32 to vector<20x1xf32>
    %154 = arith.cmpf ogt, %152, %153 : vector<20x1xf32>
    %cst_58 = arith.constant -1.000000e+30 : f32
    %155 = vector.broadcast %cst_58 : f32 to vector<20x1xf32>
    %156 = arith.select %154, %145, %155 : vector<20x1xi1>, vector<20x1xf32>
    %157 = vector.shape_cast %156 : vector<20x1xf32> to vector<1x20x1xf32>
    %cst_59 = arith.constant dense<0xFF800000> : vector<1xf32>
    %158 = vector.multi_reduction <maximumf>, %157, %cst_59 [1, 2] : vector<1x20x1xf32> to vector<1xf32>
    %159 = vector.shape_cast %158 : vector<1xf32> to vector<1x1x1xf32>
    %160 = vector.extract %159[0, 0, 0] : f32 from vector<1x1x1xf32>
    %161 = vector.broadcast %160 : f32 to vector<1x1xf32>
    %162 = vector.broadcast %161 : vector<1x1xf32> to vector<20x1xf32>
    %163 = arith.subf %156, %162 : vector<20x1xf32>
    %164 = math.exp %163 : vector<20x1xf32>
    %165 = vector.shape_cast %164 : vector<20x1xf32> to vector<1x20x1xf32>
    %cst_60 = arith.constant dense<0.000000e+00> : vector<1xf32>
    %166 = vector.multi_reduction <add>, %165, %cst_60 [1, 2] : vector<1x20x1xf32> to vector<1xf32>
    %167 = vector.shape_cast %166 : vector<1xf32> to vector<1x1x1xf32>
    %168 = vector.extract %167[0, 0, 0] : f32 from vector<1x1x1xf32>
    %169 = vector.broadcast %168 : f32 to vector<1x1xf32>
    %170 = tpu.reciprocal %169 {approx = true} : vector<1x1xf32> -> vector<1x1xf32>
    %171 = vector.broadcast %170 : vector<1x1xf32> to vector<20x1xf32>
    %172 = arith.mulf %164, %171 : vector<20x1xf32>
    %173 = vector.broadcast %172 : vector<20x1xf32> to vector<20x128xf32>
    %174 = arith.mulf %173, %15 : vector<20x128xf32>
    %cst_61 = arith.constant dense<0.000000e+00> : vector<128xf32>
    %175 = vector.multi_reduction <add>, %174, %cst_61 [0] : vector<20x128xf32> to vector<128xf32>
    %176 = vector.shape_cast %175 : vector<128xf32> to vector<1x128xf32>
    %c10_i32_62 = arith.constant 10 : i32
    %177 = vector.broadcast %c10_i32_62 : i32 to vector<20x1xi32>
    %178 = arith.cmpi sge, %44, %177 : vector<20x1xi32>
    %c20_i32_63 = arith.constant 20 : i32
    %179 = vector.broadcast %c20_i32_63 : i32 to vector<20x1xi32>
    %180 = arith.cmpi slt, %44, %179 : vector<20x1xi32>
    %181 = arith.andi %178, %180 : vector<20x1xi1>
    %182 = arith.extui %181 : vector<20x1xi1> to vector<20x1xi32>
    %183 = arith.sitofp %182 : vector<20x1xi32> to vector<20x1xf32>
    %cst_64 = arith.constant 0.000000e+00 : f32
    %184 = vector.broadcast %cst_64 : f32 to vector<20x1xf32>
    %185 = arith.cmpf ogt, %183, %184 : vector<20x1xf32>
    %cst_65 = arith.constant -1.000000e+30 : f32
    %186 = vector.broadcast %cst_65 : f32 to vector<20x1xf32>
    %187 = arith.select %185, %145, %186 : vector<20x1xi1>, vector<20x1xf32>
    %188 = vector.shape_cast %187 : vector<20x1xf32> to vector<1x20x1xf32>
    %cst_66 = arith.constant dense<0xFF800000> : vector<1xf32>
    %189 = vector.multi_reduction <maximumf>, %188, %cst_66 [1, 2] : vector<1x20x1xf32> to vector<1xf32>
    %190 = vector.shape_cast %189 : vector<1xf32> to vector<1x1x1xf32>
    %191 = vector.extract %190[0, 0, 0] : f32 from vector<1x1x1xf32>
    %192 = vector.broadcast %191 : f32 to vector<1x1xf32>
    %193 = vector.broadcast %192 : vector<1x1xf32> to vector<20x1xf32>
    %194 = arith.subf %187, %193 : vector<20x1xf32>
    %195 = math.exp %194 : vector<20x1xf32>
    %196 = vector.shape_cast %195 : vector<20x1xf32> to vector<1x20x1xf32>
    %cst_67 = arith.constant dense<0.000000e+00> : vector<1xf32>
    %197 = vector.multi_reduction <add>, %196, %cst_67 [1, 2] : vector<1x20x1xf32> to vector<1xf32>
    %198 = vector.shape_cast %197 : vector<1xf32> to vector<1x1x1xf32>
    %199 = vector.extract %198[0, 0, 0] : f32 from vector<1x1x1xf32>
    %200 = vector.broadcast %199 : f32 to vector<1x1xf32>
    %201 = tpu.reciprocal %200 {approx = true} : vector<1x1xf32> -> vector<1x1xf32>
    %202 = vector.broadcast %201 : vector<1x1xf32> to vector<20x1xf32>
    %203 = arith.mulf %195, %202 : vector<20x1xf32>
    %204 = vector.broadcast %203 : vector<20x1xf32> to vector<20x128xf32>
    %205 = arith.mulf %204, %15 : vector<20x128xf32>
    %cst_68 = arith.constant dense<0.000000e+00> : vector<128xf32>
    %206 = vector.multi_reduction <add>, %205, %cst_68 [0] : vector<20x128xf32> to vector<128xf32>
    %207 = vector.shape_cast %206 : vector<128xf32> to vector<1x128xf32>
    %208 = tpu.concatenate %176, %207 in 0 : vector<1x128xf32>, vector<1x128xf32> -> vector<2x128xf32>
    %209 = arith.truncf %208 : vector<2x128xf32> to vector<2x128xbf16>
    %c0_69 = arith.constant 0 : index
    %c0_70 = arith.constant 0 : index
    %210 = vector.load %arg20[%c0_69, %c0_70] : memref<128x128xbf16, #tpu.memory_space<vmem>>, vector<128x128xbf16>
    %cst_71 = arith.constant dense<0.000000e+00> : vector<2x128xf32>
    %211 = tpu.matmul %209, %210, %cst_71 {dimension_numbers = #tpu.dot_dimension_numbers<[1], [0], [0], [1], [0, 0, 1, 1], [], []>} : vector<2x128xbf16>, vector<128x128xbf16>, vector<2x128xf32> -> vector<2x128xf32>
    %c0_72 = arith.constant 0 : index
    %c0_73 = arith.constant 0 : index
    %212 = vector.load %arg19[%c0_72, %c0_73] : memref<128x128xbf16, #tpu.memory_space<vmem>>, vector<128x128xbf16>
    %cst_74 = arith.constant dense<0.000000e+00> : vector<20x128xf32>
    %213 = tpu.matmul %106, %212, %cst_74 {dimension_numbers = #tpu.dot_dimension_numbers<[1], [0], [0], [1], [0, 0, 1, 1], [], []>} : vector<20x128xbf16>, vector<128x128xbf16>, vector<20x128xf32> -> vector<20x128xf32>
    %c0_i32_75 = arith.constant 0 : i32
    %214 = vector.broadcast %c0_i32_75 : i32 to vector<20x1xi32>
    %215 = arith.cmpi sge, %44, %214 : vector<20x1xi32>
    %c10_i32_76 = arith.constant 10 : i32
    %216 = vector.broadcast %c10_i32_76 : i32 to vector<20x1xi32>
    %217 = arith.cmpi slt, %44, %216 : vector<20x1xi32>
    %218 = arith.andi %215, %217 : vector<20x1xi1>
    %219 = arith.extui %218 : vector<20x1xi1> to vector<20x1xi32>
    %220 = arith.sitofp %219 : vector<20x1xi32> to vector<20x1xf32>
    %221 = vector.extract_strided_slice %211 {offsets = [0, 0], sizes = [1, 128], strides = [1, 1]} : vector<2x128xf32> to vector<1x128xf32>
    %222 = vector.broadcast %220 : vector<20x1xf32> to vector<20x128xf32>
    %223 = vector.broadcast %221 : vector<1x128xf32> to vector<20x128xf32>
    %224 = arith.mulf %222, %223 : vector<20x128xf32>
    %225 = arith.addf %213, %224 : vector<20x128xf32>
    %c10_i32_77 = arith.constant 10 : i32
    %226 = vector.broadcast %c10_i32_77 : i32 to vector<20x1xi32>
    %227 = arith.cmpi sge, %44, %226 : vector<20x1xi32>
    %c20_i32_78 = arith.constant 20 : i32
    %228 = vector.broadcast %c20_i32_78 : i32 to vector<20x1xi32>
    %229 = arith.cmpi slt, %44, %228 : vector<20x1xi32>
    %230 = arith.andi %227, %229 : vector<20x1xi1>
    %231 = arith.extui %230 : vector<20x1xi1> to vector<20x1xi32>
    %232 = arith.sitofp %231 : vector<20x1xi32> to vector<20x1xf32>
    %233 = vector.extract_strided_slice %211 {offsets = [1, 0], sizes = [1, 128], strides = [1, 1]} : vector<2x128xf32> to vector<1x128xf32>
    %234 = vector.broadcast %232 : vector<20x1xf32> to vector<20x128xf32>
    %235 = vector.broadcast %233 : vector<1x128xf32> to vector<20x128xf32>
    %236 = arith.mulf %234, %235 : vector<20x128xf32>
    %237 = arith.addf %225, %236 : vector<20x128xf32>
    %c0_79 = arith.constant 0 : index
    %c0_80 = arith.constant 0 : index
    %238 = vector.load %arg21[%c0_79, %c0_80] : memref<1x128xf32, #tpu.memory_space<vmem>>, vector<1x128xf32>
    %239 = math.tanh %237 : vector<20x128xf32>
    %240 = vector.broadcast %238 : vector<1x128xf32> to vector<20x128xf32>
    %241 = arith.mulf %240, %239 : vector<20x128xf32>
    %cst_81 = arith.constant dense<0.000000e+00> : vector<20xf32>
    %242 = vector.multi_reduction <add>, %241, %cst_81 [1] : vector<20x128xf32> to vector<20xf32>
    %243 = vector.shape_cast %242 : vector<20xf32> to vector<20x1xf32>
    %c0_82 = arith.constant 0 : index
    %c0_83 = arith.constant 0 : index
    %244 = vector.load %arg3[%c0_82, %c0_83] : memref<20x1xf32, #tpu.memory_space<vmem>>, vector<20x1xf32>
    %245 = arith.sitofp %44 : vector<20x1xi32> to vector<20x1xf32>
    %c0_i32_84 = arith.constant 0 : i32
    %246 = vector.broadcast %c0_i32_84 : i32 to vector<20x1xi32>
    %247 = arith.cmpi sge, %44, %246 : vector<20x1xi32>
    %c10_i32_85 = arith.constant 10 : i32
    %248 = vector.broadcast %c10_i32_85 : i32 to vector<20x1xi32>
    %249 = arith.cmpi slt, %44, %248 : vector<20x1xi32>
    %250 = arith.andi %247, %249 : vector<20x1xi1>
    %251 = arith.extui %250 : vector<20x1xi1> to vector<20x1xi32>
    %252 = arith.sitofp %251 : vector<20x1xi32> to vector<20x1xf32>
    %253 = arith.mulf %252, %244 : vector<20x1xf32>
    %cst_86 = arith.constant 0.000000e+00 : f32
    %254 = vector.broadcast %cst_86 : f32 to vector<20x1xf32>
    %255 = arith.cmpf ogt, %253, %254 : vector<20x1xf32>
    %cst_87 = arith.constant -1.000000e+30 : f32
    %256 = vector.broadcast %cst_87 : f32 to vector<20x1xf32>
    %257 = arith.select %255, %243, %256 : vector<20x1xi1>, vector<20x1xf32>
    %258 = vector.shape_cast %257 : vector<20x1xf32> to vector<1x20x1xf32>
    %cst_88 = arith.constant dense<0xFF800000> : vector<1xf32>
    %259 = vector.multi_reduction <maximumf>, %258, %cst_88 [1, 2] : vector<1x20x1xf32> to vector<1xf32>
    %260 = vector.shape_cast %259 : vector<1xf32> to vector<1x1x1xf32>
    %261 = vector.extract %260[0, 0, 0] : f32 from vector<1x1x1xf32>
    %262 = vector.broadcast %261 : f32 to vector<1x1xf32>
    %263 = vector.broadcast %262 : vector<1x1xf32> to vector<20x1xf32>
    %264 = arith.subf %257, %263 : vector<20x1xf32>
    %265 = math.exp %264 : vector<20x1xf32>
    %266 = vector.shape_cast %265 : vector<20x1xf32> to vector<1x20x1xf32>
    %cst_89 = arith.constant dense<0.000000e+00> : vector<1xf32>
    %267 = vector.multi_reduction <add>, %266, %cst_89 [1, 2] : vector<1x20x1xf32> to vector<1xf32>
    %268 = vector.shape_cast %267 : vector<1xf32> to vector<1x1x1xf32>
    %269 = vector.extract %268[0, 0, 0] : f32 from vector<1x1x1xf32>
    %270 = vector.broadcast %269 : f32 to vector<1x1xf32>
    %271 = tpu.reciprocal %270 {approx = true} : vector<1x1xf32> -> vector<1x1xf32>
    %272 = vector.broadcast %271 : vector<1x1xf32> to vector<20x1xf32>
    %273 = arith.mulf %265, %272 : vector<20x1xf32>
    %274 = vector.shape_cast %273 : vector<20x1xf32> to vector<1x20x1xf32>
    %cst_90 = arith.constant dense<0xFF800000> : vector<1xf32>
    %275 = vector.multi_reduction <maximumf>, %274, %cst_90 [1, 2] : vector<1x20x1xf32> to vector<1xf32>
    %276 = vector.shape_cast %275 : vector<1xf32> to vector<1x1x1xf32>
    %277 = vector.extract %276[0, 0, 0] : f32 from vector<1x1x1xf32>
    %278 = vector.broadcast %277 : f32 to vector<1x1xf32>
    %279 = vector.broadcast %278 : vector<1x1xf32> to vector<20x1xf32>
    %280 = arith.cmpf oge, %273, %279 : vector<20x1xf32>
    %cst_91 = arith.constant 2.000000e+01 : f32
    %281 = vector.broadcast %cst_91 : f32 to vector<20x1xf32>
    %282 = arith.select %280, %245, %281 : vector<20x1xi1>, vector<20x1xf32>
    %283 = vector.shape_cast %282 : vector<20x1xf32> to vector<1x20x1xf32>
    %cst_92 = arith.constant dense<0x7F800000> : vector<1xf32>
    %284 = vector.multi_reduction <minimumf>, %283, %cst_92 [1, 2] : vector<1x20x1xf32> to vector<1xf32>
    %285 = vector.shape_cast %284 : vector<1xf32> to vector<1x1x1xf32>
    %286 = vector.extract %285[0, 0, 0] : f32 from vector<1x1x1xf32>
    %287 = vector.broadcast %286 : f32 to vector<1x1xf32>
    %cst_93 = arith.constant 0.000000e+00 : f32
    %288 = vector.broadcast %cst_93 : f32 to vector<1x1xf32>
    %289 = arith.subf %287, %288 : vector<1x1xf32>
    %290 = math.log %278 : vector<1x1xf32>
    %c10_i32_94 = arith.constant 10 : i32
    %291 = vector.broadcast %c10_i32_94 : i32 to vector<20x1xi32>
    %292 = arith.cmpi sge, %44, %291 : vector<20x1xi32>
    %c20_i32_95 = arith.constant 20 : i32
    %293 = vector.broadcast %c20_i32_95 : i32 to vector<20x1xi32>
    %294 = arith.cmpi slt, %44, %293 : vector<20x1xi32>
    %295 = arith.andi %292, %294 : vector<20x1xi1>
    %296 = arith.extui %295 : vector<20x1xi1> to vector<20x1xi32>
    %297 = arith.sitofp %296 : vector<20x1xi32> to vector<20x1xf32>
    %298 = arith.mulf %297, %244 : vector<20x1xf32>
    %cst_96 = arith.constant 0.000000e+00 : f32
    %299 = vector.broadcast %cst_96 : f32 to vector<20x1xf32>
    %300 = arith.cmpf ogt, %298, %299 : vector<20x1xf32>
    %cst_97 = arith.constant -1.000000e+30 : f32
    %301 = vector.broadcast %cst_97 : f32 to vector<20x1xf32>
    %302 = arith.select %300, %243, %301 : vector<20x1xi1>, vector<20x1xf32>
    %303 = vector.shape_cast %302 : vector<20x1xf32> to vector<1x20x1xf32>
    %cst_98 = arith.constant dense<0xFF800000> : vector<1xf32>
    %304 = vector.multi_reduction <maximumf>, %303, %cst_98 [1, 2] : vector<1x20x1xf32> to vector<1xf32>
    %305 = vector.shape_cast %304 : vector<1xf32> to vector<1x1x1xf32>
    %306 = vector.extract %305[0, 0, 0] : f32 from vector<1x1x1xf32>
    %307 = vector.broadcast %306 : f32 to vector<1x1xf32>
    %308 = vector.broadcast %307 : vector<1x1xf32> to vector<20x1xf32>
    %309 = arith.subf %302, %308 : vector<20x1xf32>
    %310 = math.exp %309 : vector<20x1xf32>
    %311 = vector.shape_cast %310 : vector<20x1xf32> to vector<1x20x1xf32>
    %cst_99 = arith.constant dense<0.000000e+00> : vector<1xf32>
    %312 = vector.multi_reduction <add>, %311, %cst_99 [1, 2] : vector<1x20x1xf32> to vector<1xf32>
    %313 = vector.shape_cast %312 : vector<1xf32> to vector<1x1x1xf32>
    %314 = vector.extract %313[0, 0, 0] : f32 from vector<1x1x1xf32>
    %315 = vector.broadcast %314 : f32 to vector<1x1xf32>
    %316 = tpu.reciprocal %315 {approx = true} : vector<1x1xf32> -> vector<1x1xf32>
    %317 = vector.broadcast %316 : vector<1x1xf32> to vector<20x1xf32>
    %318 = arith.mulf %310, %317 : vector<20x1xf32>
    %319 = vector.shape_cast %318 : vector<20x1xf32> to vector<1x20x1xf32>
    %cst_100 = arith.constant dense<0xFF800000> : vector<1xf32>
    %320 = vector.multi_reduction <maximumf>, %319, %cst_100 [1, 2] : vector<1x20x1xf32> to vector<1xf32>
    %321 = vector.shape_cast %320 : vector<1xf32> to vector<1x1x1xf32>
    %322 = vector.extract %321[0, 0, 0] : f32 from vector<1x1x1xf32>
    %323 = vector.broadcast %322 : f32 to vector<1x1xf32>
    %324 = vector.broadcast %323 : vector<1x1xf32> to vector<20x1xf32>
    %325 = arith.cmpf oge, %318, %324 : vector<20x1xf32>
    %cst_101 = arith.constant 2.000000e+01 : f32
    %326 = vector.broadcast %cst_101 : f32 to vector<20x1xf32>
    %327 = arith.select %325, %245, %326 : vector<20x1xi1>, vector<20x1xf32>
    %328 = vector.shape_cast %327 : vector<20x1xf32> to vector<1x20x1xf32>
    %cst_102 = arith.constant dense<0x7F800000> : vector<1xf32>
    %329 = vector.multi_reduction <minimumf>, %328, %cst_102 [1, 2] : vector<1x20x1xf32> to vector<1xf32>
    %330 = vector.shape_cast %329 : vector<1xf32> to vector<1x1x1xf32>
    %331 = vector.extract %330[0, 0, 0] : f32 from vector<1x1x1xf32>
    %332 = vector.broadcast %331 : f32 to vector<1x1xf32>
    %cst_103 = arith.constant 1.000000e+01 : f32
    %333 = vector.broadcast %cst_103 : f32 to vector<1x1xf32>
    %334 = arith.subf %332, %333 : vector<1x1xf32>
    %335 = math.log %323 : vector<1x1xf32>
    %336 = tpu.concatenate %289, %334 in 0 : vector<1x1xf32>, vector<1x1xf32> -> vector<2x1xf32>
    %c0_104 = arith.constant 0 : index
    %c0_105 = arith.constant 0 : index
    %337 = vector.load %arg22[%c0_104, %c0_105] : memref<2x1xf32, #tpu.memory_space<vmem>>, vector<2x1xf32>
    tpu.vector_store %arg22[%c0_104, %c0_105], %336 {strides = array<i32>} : memref<2x1xf32, #tpu.memory_space<vmem>>, vector<2x1xf32>,
    %338 = tpu.concatenate %290, %335 in 0 : vector<1x1xf32>, vector<1x1xf32> -> vector<2x1xf32>
    %c0_106 = arith.constant 0 : index
    %c0_107 = arith.constant 0 : index
    %339 = vector.load %arg23[%c0_106, %c0_107] : memref<2x1xf32, #tpu.memory_space<vmem>>, vector<2x1xf32>
    tpu.vector_store %arg23[%c0_106, %c0_107], %338 {strides = array<i32>} : memref<2x1xf32, #tpu.memory_space<vmem>>, vector<2x1xf32>,
    return
  }
}

</mosaic_0001>

<bundles_post_ra>
// kernel: _decode_step_impl.1
= control target key start
LH: loop header
LB: loop body
LE: loop exit
PB: predicated region body
PF: predicated region fallthrough
CT: control target
= control target key end

     0   :  { %s3635_s0 = inlined_call_operand.vmem [shape: s32[2], index: 0, kind: input, shape index: {}]   ;;  %s3636_s1 = inlined_call_operand.vmem [shape: f32[20,2], index: 1, kind: input, shape index: {}]   ;;  %s3637_s2 = inlined_call_operand.vmem [shape: f32[20,2], index: 2, kind: input, shape index: {}]   ;;  %s3638_s3 = inlined_call_operand.vmem [shape: f32[20,1], index: 3, kind: input, shape index: {}]   ;;  %s3639_s4 = inlined_call_operand.hbm [shape: f32[2,128], index: 4, kind: input, shape index: {}]   ;;  %s3640_s5 = inlined_call_operand.vmem [shape: f32[2,128], index: 5, kind: input, shape index: {}]   ;;  %s3641_s6 = inlined_call_operand.hbm [shape: f32[1,128], index: 6, kind: input, shape index: {}]   ;;  %s3642_s7 = inlined_call_operand.vmem [shape: f32[2,128], index: 7, kind: input, shape index: {}]   ;;  %s3643_s8 = inlined_call_operand.hbm [shape: f32[1,128], index: 8, kind: input, shape index: {}]   ;;  %s3644_s9 = inlined_call_operand.hbm [shape: f32[2,128], index: 9, kind: input, shape index: {}]   ;;  %s3645_s10 = inlined_call_operand.hbm [shape: f32[1,128], index: 10, kind: input, shape index: {}]   ;;  %s3646_s11 = inlined_call_operand.hbm [shape: bf16[128,384], index: 11, kind: input, shape index: {}]   ;;  %s3647_s12 = inlined_call_operand.hbm [shape: bf16[128,384], index: 12, kind: input, shape index: {}]   ;;  %s3648_s13 = inlined_call_operand.hbm [shape: f32[1,384], index: 13, kind: input, shape index: {}]   ;;  %s3649_s14 = inlined_call_operand.hbm [shape: f32[1,384], index: 14, kind: input, shape index: {}]   ;;  %s3650_s15 = inlined_call_operand.vmem [shape: bf16[128,128], index: 15, kind: input, shape index: {}]   ;;  %s3651_s16 = inlined_call_operand.hbm [shape: bf16[128,128], index: 16, kind: input, shape index: {}]   ;;  %s3652_s17 = inlined_call_operand.hbm [shape: bf16[128,128], index: 17, kind: input, shape index: {}]   ;;  %s3653_s18 = inlined_call_operand.hbm [shape: f32[1,128], index: 18, kind: input, shape index: {}]   ;;  %s3654_s19 = inlined_call_operand.vmem [shape: bf16[128,128], index: 19, kind: input, shape index: {}]   ;;  %s3655_s20 = inlined_call_operand.hbm [shape: bf16[128,128], index: 20, kind: input, shape index: {}]   ;;  %s3656_s21 = inlined_call_operand.hbm [shape: f32[1,128], index: 21, kind: input, shape index: {}]   ;;  %s3657_s22 = inlined_call_operand.vmem [shape: f32[2,1], index: 22, kind: output, shape index: {0}]   ;;  %s3658_s23 = inlined_call_operand.vmem [shape: f32[2,1], index: 23, kind: output, shape index: {1}]   ;;  %s3659_s24 = inlined_call_operand.hbm [shape: f32[2,128], index: 24, kind: output, shape index: {2}]  }
   0x1   :  { %3670 = sst [smem:[#allocation38_spill]] %s3635_s0 }
   0x2   :  { %3671 = sst [smem:[#allocation39_spill]] %s3636_s1 }
   0x3   :  { %3672 = sst [smem:[#allocation40_spill]] %s3637_s2 }
   0x4   :  { %3673 = sst [smem:[#allocation41_spill]] %s3638_s3 }
   0x5   :  { %3674 = sst [smem:[#allocation42_spill]] %s3639_s4 }
   0x6   :  { %3675 = sst [smem:[#allocation43_spill]] %s3640_s5 }
   0x7   :  { %3676 = sst [smem:[#allocation44_spill]] %s3641_s6 }
   0x8   :  { %3677 = sst [smem:[#allocation45_spill]] %s3642_s7 }
   0x9   :  { %3678 = sst [smem:[#allocation46_spill]] %s3643_s8 }
   0xa   :  { %30 = vsyncpa [#allocation5], 0 }
   0xb   :  { %31 = vsyncpa [#allocation3], 0 }
   0xc   :  { %32 = vsyncpa [#allocation8], 0 }
   0xd   :  { %33 = vsyncpa [#allocation11], 0 }
   0xe   :  { %34 = vsyncpa [#allocation14], 0 }
   0xf   :  { %35 = vsyncpa [#allocation17], 0 }
  0x10   :  { %36 = vsyncpa [#allocation20], 0 }
  0x11   :  { %37 = vsyncpa [#allocation23], 0 }
  0x12   :  { %38 = vsyncpa [#allocation26], 0 }
  0x13   :  { %39 = vsyncpa [#allocation4], 0  ;;  %s2907_s5 = smov [#allocation7]   ;;  %s2908_s27 = smov [#allocation10]  }
  0x14   :  { %s74_s26 = sshll.u32 %s2907_s5, 4  ;;  %s96_s28 = sshll.u32 %s2908_s27, 4  ;;  %s75_s26 = int_to_ptr.vmem [resolvable:$true] %s74_s26  ;;  %s97_s28 = int_to_ptr.vmem [resolvable:$true] %s96_s28 }
  0x15   :  { %s3679_s29 = sld [smem:[#allocation44_spill]] }
  0x1b   :  { %s2545_s0 = scalar_lea.hbm %s3679_s29, 16 }
  0x1c   :  { %p2546_p0 = scmp.ne.s32.totalorder %s3679_s29, %s2545_s0  ;;  %p2549_p1 = scmp.lt.u32.totalorder %s2545_s0, %s3679_s29 }
  0x1e   :  { %p2551_p2 = pnand %p2549_p1, %p2546_p0 }
  0x20   :  { %2554 = shalt.err (!%p2551_p2)
}
  0x21   :  { %s2555_s8 = scalar_lea.vmem %s75_s26, 16  ;;  %s2559_s4 = scalar_lea.vmem %s75_s26, 32 }
  0x22   :  { %p2556_p3 = scmp.ne.s32.totalorder %s75_s26, %s2555_s8  ;;  %p2560_p4 = scmp.lt.s32.totalorder %s75_s26, %s75_s26 }
  0x23   :  { %p2561_p5 = scmp.lt.s32.totalorder %s2559_s4, %s2555_s8 }
  0x25   :  { %p2562_p6 = por %p2561_p5, %p2560_p4 }
  0x27   :  { %p2563_p7 = pnand %p2562_p6, %p2556_p3 }
  0x29   :  { %2566 = shalt.err (!%p2563_p7)
}
  0x2a   :  { %77 = dma.hbm_to_vmem [thread:$0]  %s3679_s29, 16, %s75_s26, [#allocation8]  }
  0x2b   :  { %s2567_s2 = scalar_lea.hbm %s3644_s9, 32 }
  0x2c   :  { %p2568_p8 = scmp.ne.s32.totalorder %s3644_s9, %s2567_s2  ;;  %p2571_p9 = scmp.lt.u32.totalorder %s2567_s2, %s3644_s9 }
  0x2e   :  { %p2573_p10 = pnand %p2571_p9, %p2568_p8 }
  0x30   :  { %2576 = shalt.err (!%p2573_p10)
}
  0x31   :  { %s2577_s25 = scalar_lea.vmem %s97_s28, 32  ;;  %p2582_p12 = scmp.lt.s32.totalorder %s97_s28, %s97_s28 }
  0x32   :  { %p2578_p11 = scmp.ne.s32.totalorder %s97_s28, %s2577_s25  ;;  %p2583_p13 = scmp.lt.s32.totalorder %s2577_s25, %s2577_s25 }
  0x34   :  { %p2584_p0 = por %p2583_p13, %p2582_p12 }
  0x36   :  { %p2585_p1 = pnand %p2584_p0, %p2578_p11 }
  0x38   :  { %2588 = shalt.err (!%p2585_p1)
}
  0x39   :  { %99 = dma.hbm_to_vmem [thread:$0]  %s3644_s9, 32, %s97_s28, [#allocation11]  }
  0x3a   :  { %s2909_s8 = smov [#allocation13]   ;;  %s2589_s27 = scalar_lea.hbm %s3646_s11, 3072 }
  0x3b   :  { %s115_s4 = sshll.u32 %s2909_s8, 4  ;;  %p2590_p2 = scmp.ne.s32.totalorder %s3646_s11, %s2589_s27  ;;  %s116_s4 = int_to_ptr.vmem [resolvable:$true] %s115_s4 }
  0x3c   :  { %p2593_p3 = scmp.lt.u32.totalorder %s2589_s27, %s3646_s11 }
  0x3e   :  { %p2595_p4 = pnand %p2593_p3, %p2590_p2 }
  0x40   :  { %2598 = shalt.err (!%p2595_p4)
}
  0x41   :  { %s2599_s30 = scalar_lea.vmem %s116_s4, 3072  ;;  %p2604_p6 = scmp.lt.s32.totalorder %s116_s4, %s116_s4 }
  0x42   :  { %p2600_p5 = scmp.ne.s32.totalorder %s116_s4, %s2599_s30  ;;  %p2605_p7 = scmp.lt.s32.totalorder %s2599_s30, %s2599_s30 }
  0x44   :  { %p2606_p8 = por %p2605_p7, %p2604_p6 }
  0x46   :  { %p2607_p9 = pnand %p2606_p8, %p2600_p5 }
  0x48   :  { %2610 = shalt.err (!%p2607_p9)
}
  0x49   :  { %s3668_s9 = smov 192   ;;  %s3669_s28 = smov 12  }
  0x4a   :  { %121 = dma.hbm_to_vmem [thread:$0]  %s3646_s11, 3072, %s116_s4, [#allocation14], %s3668_s9, %s3668_s9, %s3669_s28  }
  0x4b   :  { %s2912_s26 = smov [#allocation16]   ;;  %s2913_s8 = smov [#allocation19]  }
  0x4c   :  { %s140_s29 = sshll.u32 %s2912_s26, 4  ;;  %s161_s1 = sshll.u32 %s2913_s8, 4  ;;  %s141_s29 = int_to_ptr.vmem [resolvable:$true] %s140_s29  ;;  %s162_s1 = int_to_ptr.vmem [resolvable:$true] %s161_s1 }
  0x4d   :  { %s2611_s6 = scalar_lea.hbm %s3648_s13, 48 }
  0x4e   :  { %p2612_p10 = scmp.ne.s32.totalorder %s3648_s13, %s2611_s6  ;;  %p2615_p11 = scmp.lt.u32.totalorder %s2611_s6, %s3648_s13 }
  0x50   :  { %p2617_p12 = pnand %p2615_p11, %p2612_p10 }
  0x52   :  { %2620 = shalt.err (!%p2617_p12)
}
  0x53   :  { %s2621_s11 = scalar_lea.vmem %s141_s29, 48  ;;  %s2625_s4 = scalar_lea.vmem %s141_s29, 64 }
  0x54   :  { %p2622_p13 = scmp.ne.s32.totalorder %s141_s29, %s2621_s11  ;;  %p2626_p0 = scmp.lt.s32.totalorder %s141_s29, %s141_s29 }
  0x55   :  { %p2627_p1 = scmp.lt.s32.totalorder %s2625_s4, %s2621_s11 }
  0x57   :  { %p2628_p2 = por %p2627_p1, %p2626_p0 }
  0x59   :  { %p2629_p3 = pnand %p2628_p2, %p2622_p13 }
  0x5b   :  { %2632 = shalt.err (!%p2629_p3)
}
  0x5c   :  { %143 = dma.hbm_to_vmem [thread:$0]  %s3648_s13, 48, %s141_s29, [#allocation17]  }
  0x5d   :  { %s2633_s5 = scalar_lea.hbm %s3651_s16, 1024 }
  0x5e   :  { %p2634_p4 = scmp.ne.s32.totalorder %s3651_s16, %s2633_s5  ;;  %p2637_p5 = scmp.lt.u32.totalorder %s2633_s5, %s3651_s16 }
  0x60   :  { %p2639_p6 = pnand %p2637_p5, %p2634_p4 }
  0x62   :  { %2642 = shalt.err (!%p2639_p6)
}
  0x63   :  { %s2643_s0 = scalar_lea.vmem %s162_s1, 1024  ;;  %p2648_p8 = scmp.lt.s32.totalorder %s162_s1, %s162_s1 }
  0x64   :  { %p2644_p7 = scmp.ne.s32.totalorder %s162_s1, %s2643_s0  ;;  %p2649_p9 = scmp.lt.s32.totalorder %s2643_s0, %s2643_s0 }
  0x66   :  { %p2650_p10 = por %p2649_p9, %p2648_p8 }
  0x68   :  { %p2651_p11 = pnand %p2650_p10, %p2644_p7 }
  0x6a   :  { %2654 = shalt.err (!%p2651_p11)
}
  0x6b   :  { %s2914_s13 = smov 64   ;;  %s2915_s29 = smov 4  }
  0x6c   :  { %167 = dma.hbm_to_vmem [thread:$0]  %s3651_s16, 1024, %s162_s1, [#allocation20], %s2914_s13, %s2914_s13, %s2915_s29  }
  0x6d   :  { %s2916_s4 = smov [#allocation22]   ;;  %s3680_s8 = sld [smem:[#allocation38_spill]] }
  0x6e   :  { %s186_s3 = sshll.u32 %s2916_s4, 4  ;;  %s2655_s2 = scalar_lea.hbm %s3653_s18, 16  ;;  %s187_s3 = int_to_ptr.vmem [resolvable:$true] %s186_s3 }
  0x6f   :  { %p2656_p12 = scmp.ne.s32.totalorder %s3653_s18, %s2655_s2  ;;  %p2659_p13 = scmp.lt.u32.totalorder %s2655_s2, %s3653_s18 }
  0x71   :  { %p2661_p0 = pnand %p2659_p13, %p2656_p12 }
  0x73   :  { %s46_s5 = sshll.u32 %s3680_s8, 4  ;;  %s47_s5 = int_to_ptr.vmem [resolvable:$true] %s46_s5 }
  0x74   :  { %2664 = shalt.err (!%p2661_p0)
}
  0x75   :  { %s2665_s16 = scalar_lea.vmem %s187_s3, 16  ;;  %s2669_s1 = scalar_lea.vmem %s187_s3, 32 }
  0x76   :  { %p2666_p1 = scmp.ne.s32.totalorder %s187_s3, %s2665_s16  ;;  %p2670_p2 = scmp.lt.s32.totalorder %s187_s3, %s187_s3 }
  0x77   :  { %p2671_p3 = scmp.lt.s32.totalorder %s2669_s1, %s2665_s16 }
  0x79   :  { %p2672_p4 = por %p2671_p3, %p2670_p2 }
  0x7b   :  { %p2673_p5 = pnand %p2672_p4, %p2666_p1 }
  0x7d   :  { %2676 = shalt.err (!%p2673_p5)
}
  0x7e   :  { %189 = dma.hbm_to_vmem [thread:$0]  %s3653_s18, 16, %s187_s3, [#allocation23]  }
  0x7f   :  { %s2677_s4 = scalar_lea.vmem %s47_s5, 16  ;;  %p2682_p7 = scmp.lt.s32.totalorder %s47_s5, %s47_s5 }
  0x80   :  { %p2678_p6 = scmp.ne.s32.totalorder %s47_s5, %s2677_s4  ;;  %p2683_p8 = scmp.lt.s32.totalorder %s2677_s4, %s2677_s4 }
  0x82   :  { %p2684_p9 = por %p2683_p8, %p2682_p7 }
  0x84   :  { %p2685_p10 = pnand %p2684_p9, %p2678_p6 }
  0x86   :  { %2688 = shalt.err (!%p2685_p10)
}
  0x87   :  { %s2917_s9 = smov [#allocation2]   ;;  %s2918_s28 = smov [#allocation6]  }
  0x88   :  { %49 = dma.vmem_to_smem %s47_s5, 16, %s2917_s9, [#allocation5]  }
  0x89   :  { %s62_s25 = sshll.u32 %s2918_s28, 4  ;;  %s2919_s26 = smov [#allocation9]   ;;  %s63_s25 = int_to_ptr.vmem [resolvable:$true] %s62_s25 }
  0x8a   :  { %s86_s8 = sshll.u32 %s2919_s26, 4  ;;  %s3681_s2 = sld [smem:[#allocation42_spill]]  ;;  %s87_s8 = int_to_ptr.vmem [resolvable:$true] %s86_s8 }
  0x90   :  { %s2689_s7 = scalar_lea.hbm %s3681_s2, 32 }
  0x91   :  { %p2690_p11 = scmp.ne.s32.totalorder %s3681_s2, %s2689_s7  ;;  %p2693_p12 = scmp.lt.u32.totalorder %s2689_s7, %s3681_s2 }
  0x93   :  { %p2695_p13 = pnand %p2693_p12, %p2690_p11 }
  0x95   :  { %2698 = shalt.err (!%p2695_p13)
}
  0x96   :  { %s2699_s5 = scalar_lea.vmem %s63_s25, 32  ;;  %p2704_p1 = scmp.lt.s32.totalorder %s63_s25, %s63_s25 }
  0x97   :  { %p2700_p0 = scmp.ne.s32.totalorder %s63_s25, %s2699_s5  ;;  %p2705_p2 = scmp.lt.s32.totalorder %s2699_s5, %s2699_s5 }
  0x99   :  { %p2706_p3 = por %p2705_p2, %p2704_p1 }
  0x9b   :  { %p2707_p4 = pnand %p2706_p3, %p2700_p0 }
  0x9d   :  { %2710 = shalt.err (!%p2707_p4)
}
  0x9e   :  { %65 = dma.hbm_to_vmem [thread:$0]  %s3681_s2, 32, %s63_s25, [#allocation3]  }
  0x9f   :  { %s3682_s9 = sld [smem:[#allocation46_spill]] }
  0xa5   :  { %s2711_s28 = scalar_lea.hbm %s3682_s9, 16 }
  0xa6   :  { %p2712_p5 = scmp.ne.s32.totalorder %s3682_s9, %s2711_s28  ;;  %p2715_p6 = scmp.lt.u32.totalorder %s2711_s28, %s3682_s9 }
  0xa8   :  { %p2717_p7 = pnand %p2715_p6, %p2712_p5 }
  0xaa   :  { %2720 = shalt.err (!%p2717_p7)
}
  0xab   :  { %s2721_s0 = scalar_lea.vmem %s87_s8, 16  ;;  %s2725_s18 = scalar_lea.vmem %s87_s8, 32 }
  0xac   :  { %p2722_p8 = scmp.ne.s32.totalorder %s87_s8, %s2721_s0  ;;  %p2726_p9 = scmp.lt.s32.totalorder %s87_s8, %s87_s8 }
  0xad   :  { %p2727_p10 = scmp.lt.s32.totalorder %s2725_s18, %s2721_s0 }
  0xaf   :  { %p2728_p11 = por %p2727_p10, %p2726_p9 }
  0xb1   :  { %p2729_p12 = pnand %p2728_p11, %p2722_p8 }
  0xb3   :  { %2732 = shalt.err (!%p2729_p12)
}
  0xb4   :  { %89 = dma.hbm_to_vmem [thread:$0]  %s3682_s9, 16, %s87_s8, [#allocation8]  }
  0xb5   :  { %s2920_s3 = smov [#allocation12]   ;;  %s2921_s5 = smov [#allocation15]  }
  0xb6   :  { %s106_s16 = sshll.u32 %s2920_s3, 4  ;;  %s127_s1 = sshll.u32 %s2921_s5, 4  ;;  %s107_s16 = int_to_ptr.vmem [resolvable:$true] %s106_s16  ;;  %s128_s1 = int_to_ptr.vmem [resolvable:$true] %s127_s1 }
  0xb7   :  { %s2733_s4 = scalar_lea.hbm %s3645_s10, 16 }
  0xb8   :  { %p2734_p13 = scmp.ne.s32.totalorder %s3645_s10, %s2733_s4  ;;  %p2737_p0 = scmp.lt.u32.totalorder %s2733_s4, %s3645_s10 }
  0xba   :  { %p2739_p1 = pnand %p2737_p0, %p2734_p13 }
  0xbc   :  { %2742 = shalt.err (!%p2739_p1)
}
  0xbd   :  { %s2743_s8 = scalar_lea.vmem %s107_s16, 16  ;;  %s2747_s9 = scalar_lea.vmem %s107_s16, 32 }
  0xbe   :  { %p2744_p2 = scmp.ne.s32.totalorder %s107_s16, %s2743_s8  ;;  %p2748_p3 = scmp.lt.s32.totalorder %s107_s16, %s107_s16 }
  0xbf   :  { %p2749_p4 = scmp.lt.s32.totalorder %s2747_s9, %s2743_s8 }
  0xc1   :  { %p2750_p5 = por %p2749_p4, %p2748_p3 }
  0xc3   :  { %p2751_p6 = pnand %p2750_p5, %p2744_p2 }
  0xc5   :  { %2754 = shalt.err (!%p2751_p6)
}
  0xc6   :  { %109 = dma.hbm_to_vmem [thread:$0]  %s3645_s10, 16, %s107_s16, [#allocation11]  }
  0xc7   :  { %s2755_s2 = scalar_lea.hbm %s3647_s12, 3072 }
  0xc8   :  { %p2756_p7 = scmp.ne.s32.totalorder %s3647_s12, %s2755_s2  ;;  %p2759_p8 = scmp.lt.u32.totalorder %s2755_s2, %s3647_s12 }
  0xca   :  { %p2761_p9 = pnand %p2759_p8, %p2756_p7 }
  0xcc   :  { %2764 = shalt.err (!%p2761_p9)
}
  0xcd   :  { %s2765_s4 = scalar_lea.vmem %s128_s1, 3072  ;;  %p2770_p11 = scmp.lt.s32.totalorder %s128_s1, %s128_s1 }
  0xce   :  { %p2766_p10 = scmp.ne.s32.totalorder %s128_s1, %s2765_s4  ;;  %p2771_p12 = scmp.lt.s32.totalorder %s2765_s4, %s2765_s4 }
  0xd0   :  { %p2772_p13 = por %p2771_p12, %p2770_p11 }
  0xd2   :  { %p2773_p0 = pnand %p2772_p13, %p2766_p10 }
  0xd4   :  { %2776 = shalt.err (!%p2773_p0)
}
  0xd5   :  { %s3683_s10 = smov 12   ;;  %s3684_s16 = smov 192  }
  0xd6   :  { %133 = dma.hbm_to_vmem [thread:$0]  %s3647_s12, 3072, %s128_s1, [#allocation14], %s3684_s16, %s3684_s16, %s3683_s10  }
  0xd7   :  { %s2922_s27 = smov [#allocation18]   ;;  %s2923_s8 = smov [#allocation21]  }
  0xd8   :  { %s150_s6 = sshll.u32 %s2922_s27, 4  ;;  %s173_s9 = sshll.u32 %s2923_s8, 4  ;;  %s151_s6 = int_to_ptr.vmem [resolvable:$true] %s150_s6  ;;  %s174_s9 = int_to_ptr.vmem [resolvable:$true] %s173_s9 }
  0xd9   :  { %s2777_s18 = scalar_lea.hbm %s3649_s14, 48 }
  0xda   :  { %p2778_p1 = scmp.ne.s32.totalorder %s3649_s14, %s2777_s18  ;;  %p2781_p2 = scmp.lt.u32.totalorder %s2777_s18, %s3649_s14 }
  0xdc   :  { %p2783_p3 = pnand %p2781_p2, %p2778_p1 }
  0xde   :  { %2786 = shalt.err (!%p2783_p3)
}
  0xdf   :  { %s2787_s12 = scalar_lea.vmem %s151_s6, 48  ;;  %s2791_s1 = scalar_lea.vmem %s151_s6, 64 }
  0xe0   :  { %p2788_p4 = scmp.ne.s32.totalorder %s151_s6, %s2787_s12  ;;  %p2792_p5 = scmp.lt.s32.totalorder %s151_s6, %s151_s6 }
  0xe1   :  { %p2793_p6 = scmp.lt.s32.totalorder %s2791_s1, %s2787_s12 }
  0xe3   :  { %p2794_p7 = por %p2793_p6, %p2792_p5 }
  0xe5   :  { %p2795_p8 = pnand %p2794_p7, %p2788_p4 }
  0xe7   :  { %2798 = shalt.err (!%p2795_p8)
}
  0xe8   :  { %153 = dma.hbm_to_vmem [thread:$0]  %s3649_s14, 48, %s151_s6, [#allocation17]  }
  0xe9   :  { %s2799_s16 = scalar_lea.hbm %s3652_s17, 1024 }
  0xea   :  { %p2800_p9 = scmp.ne.s32.totalorder %s3652_s17, %s2799_s16  ;;  %p2803_p10 = scmp.lt.u32.totalorder %s2799_s16, %s3652_s17 }
  0xec   :  { %p2805_p11 = pnand %p2803_p10, %p2800_p9 }
  0xee   :  { %2808 = shalt.err (!%p2805_p11)
}
  0xef   :  { %s2809_s7 = scalar_lea.vmem %s174_s9, 1024  ;;  %p2814_p13 = scmp.lt.s32.totalorder %s174_s9, %s174_s9 }
  0xf0   :  { %p2810_p12 = scmp.ne.s32.totalorder %s174_s9, %s2809_s7  ;;  %p2815_p0 = scmp.lt.s32.totalorder %s2809_s7, %s2809_s7 }
  0xf2   :  { %p2816_p1 = por %p2815_p0, %p2814_p13 }
  0xf4   :  { %p2817_p2 = pnand %p2816_p1, %p2810_p12 }
  0xf6   :  { %2820 = shalt.err (!%p2817_p2)
}
  0xf7   :  { %179 = dma.hbm_to_vmem [thread:$0]  %s3652_s17, 1024, %s174_s9, [#allocation20], %s2914_s13, %s2914_s13, %s2915_s29  }
  0xf8   :  { %s2924_s0 = smov [#allocation24]   ;;  %s2925_s25 = smov [#allocation25]  }
  0xf9   :  { %s197_s18 = sshll.u32 %s2924_s0, 4  ;;  %s210_s2 = sshll.u32 %s2925_s25, 4  ;;  %s198_s18 = int_to_ptr.vmem [resolvable:$true] %s197_s18  ;;  %s211_s2 = int_to_ptr.vmem [resolvable:$true] %s210_s2 }
  0xfa   :  { %s2821_s12 = scalar_lea.hbm %s3655_s20, 1024 }
  0xfb   :  { %p2822_p3 = scmp.ne.s32.totalorder %s3655_s20, %s2821_s12  ;;  %p2825_p4 = scmp.lt.u32.totalorder %s2821_s12, %s3655_s20 }
  0xfd   :  { %p2827_p5 = pnand %p2825_p4, %p2822_p3 }
  0xff   :  { %2830 = shalt.err (!%p2827_p5)
}
 0x100   :  { %s2831_s17 = scalar_lea.vmem %s198_s18, 1024  ;;  %p2836_p7 = scmp.lt.s32.totalorder %s198_s18, %s198_s18 }
 0x101   :  { %p2832_p6 = scmp.ne.s32.totalorder %s198_s18, %s2831_s17  ;;  %p2837_p8 = scmp.lt.s32.totalorder %s2831_s17, %s2831_s17 }
 0x103   :  { %p2838_p9 = por %p2837_p8, %p2836_p7 }
 0x105   :  { %p2839_p10 = pnand %p2838_p9, %p2832_p6 }
 0x107   :  { %2842 = shalt.err (!%p2839_p10)
}
 0x108   :  { %203 = dma.hbm_to_vmem [thread:$0]  %s3655_s20, 1024, %s198_s18, [#allocation23], %s2914_s13, %s2914_s13, %s2915_s29  }
 0x109   :  { %s2843_s26 = scalar_lea.hbm %s3656_s21, 16 }
 0x10a   :  { %p2844_p11 = scmp.ne.s32.totalorder %s3656_s21, %s2843_s26  ;;  %p2847_p12 = scmp.lt.u32.totalorder %s2843_s26, %s3656_s21 }
 0x10c   :  { %p2849_p13 = pnand %p2847_p12, %p2844_p11 }
 0x10e   :  { %2852 = shalt.err (!%p2849_p13)
}
 0x10f   :  { %s2853_s6 = scalar_lea.vmem %s211_s2, 16  ;;  %s2857_s0 = scalar_lea.vmem %s211_s2, 32 }
 0x110   :  { %p2854_p0 = scmp.ne.s32.totalorder %s211_s2, %s2853_s6  ;;  %p2858_p1 = scmp.lt.s32.totalorder %s211_s2, %s211_s2 }
 0x111   :  { %p2859_p2 = scmp.lt.s32.totalorder %s2857_s0, %s2853_s6 }
 0x113   :  { %p2860_p3 = por %p2859_p2, %p2858_p1 }
 0x115   :  { %p2861_p4 = pnand %p2860_p3, %p2854_p0 }
 0x117   :  { %2864 = shalt.err (!%p2861_p4)
}
 0x118   :  { %213 = dma.hbm_to_vmem [thread:$0]  %s3656_s21, 16, %s211_s2, [#allocation26]  }
 0x119   :  { %2887 = dma.done.wait [#allocation5], 16  }
 0x11a   :  { %2888 = vsyncadd [#allocation5], 4294967280 }
 0x11b   :  { %2889 = dma.done.wait [#allocation3], 32  }
 0x11c   :  { %2890 = vsyncadd [#allocation3], 4294967264 }
 0x11d   :  { %2891 = dma.done.wait [#allocation8], 32  }
 0x11e   :  { %2892 = vsyncadd [#allocation8], 4294967264 }
 0x11f   :  { %2893 = dma.done.wait [#allocation11], 48  }
 0x120   :  { %2894 = vsyncadd [#allocation11], 4294967248 }
 0x121   :  { %2895 = dma.done.wait [#allocation14], 6144  }
 0x122   :  { %2896 = vsyncadd [#allocation14], 4294961152 }
 0x123   :  { %2897 = dma.done.wait [#allocation17], 96  }
 0x124   :  { %2898 = vsyncadd [#allocation17], 4294967200 }
 0x125   :  { %2899 = dma.done.wait [#allocation20], 2048  }
 0x126   :  { %2900 = vsyncadd [#allocation20], 4294965248 }
 0x127   :  { %2901 = dma.done.wait [#allocation23], 1040  }
 0x128   :  { %2902 = vsyncadd [#allocation23], 4294966256 }
 0x129   :  { %2903 = dma.done.wait [#allocation26], 16  }
 0x12a   :  { %2904 = vsyncadd [#allocation26], 4294967280 }
 0x12b   :  { %259 = sfence }
 0x12c   :  { %s3685_s18 = sld [smem:[#allocation39_spill]]  ;;  %v2926_v2 = vmov 0   ;;  %v2383_v4 = vld [vmem:[#allocation13 + $0x4] ss:$12 sps:$4 sm:$0xff]   ;;  %v2927_v5 = vmov 0.0   ;;  %v2928_v8 = vmov 1   ;;  %v408_v34 = vlaneseq }
 0x12d   :  { %2376 = vset.pattern.permute.xlu1 %v2926_v2  ;;  %2375 = vset.pattern.permute.xlu0 %v2926_v2  ;;  %v2385_v6 = vld [vmem:[#allocation13] ss:$12 sps:$4 sm:$0xff]   ;;  %v2386_v7 = vld [vmem:[#allocation13 + $0x8] ss:$12 sps:$4 sm:$0xff]   ;;  %v2389_v10 = vld [vmem:[#allocation13 + $0x18] ss:$12 sps:$4 sm:$0xff]  }
 0x12e   :  { %673 = vmatprep.mubr.bf16.mxu0 %v2926_v2  ;;  %2178 = vmatprep.subr.bf16.mxu1 %v2927_v5  ;;  %v2387_v9 = vld [vmem:[#allocation13 + $0x1c] ss:$12 sps:$4 sm:$0xff]   ;;  %v2390_v11 = vld [vmem:[#allocation13 + $0x20] ss:$12 sps:$4 sm:$0xff]   ;;  %s3686_s30 = sld [smem:[#allocation40_spill]]  ;;  %vm2929_vm0 = vmmov 0  }
 0x12f   :  { %641 = vmatprep.subr.bf16.mxu0 %v2383_v4  ;;  %2179 = vmatpush3.bf16.msra.mxu1 %v2386_v7  ;;  %v2391_v12 = vld [vmem:[#allocation13 + $0x34] ss:$12 sps:$4 sm:$0xff]   ;;  %v2393_v15 = vld [vmem:[#allocation13 + $0x30] ss:$12 sps:$4 sm:$0xff]   ;;  %v2394_v16 = vld [vmem:[#allocation13 + $0x38] ss:$12 sps:$4 sm:$0xff]  }
 0x130   :  { %642 = vmatpush1.bf16.msra.mxu0 %v2385_v6  ;;  %2180 = vmatprep.subr.bf16.mxu1 %v2927_v5  ;;  %v2395_v17 = vld [vmem:[#allocation13 + $0x4c] ss:$12 sps:$4 sm:$0xff]   ;;  %v2397_v19 = vld [vmem:[#allocation13 + $0x48] ss:$12 sps:$4 sm:$0xff]   ;;  %v2398_v20 = vld [vmem:[#allocation13 + $0x50] ss:$12 sps:$4 sm:$0xff]  }
 0x131   :  { %643 = vmatprep.subr.bf16.mxu0 %v2387_v9  ;;  %v2399_v21 = vld [vmem:[#allocation13 + $0x64] ss:$12 sps:$4 sm:$0xff]   ;;  %v2401_v22 = vld [vmem:[#allocation13 + $0x60] ss:$12 sps:$4 sm:$0xff]   ;;  %v2402_v23 = vld [vmem:[#allocation13 + $0x68] ss:$12 sps:$4 sm:$0xff]   ;;  %2194 = vmatprep.mubr.msk.bf16.mxu1 %vm2929_vm0, %v2927_v5 }
 0x132   :  { %v263_v0 = vld [vmem:[%s3685_s18 + $0x10] sm:$0xf]  ;;  %v261_v1 = vld [vmem:[%s3685_s18] sm:$0xff]  ;;  %v262_v3 = vld [vmem:[%s3685_s18 + $0x8] sm:$0xff]  ;;  %s2012_s10 = sld [smem:[#allocation2 + $0x1]]  ;;  %s412_s16 = sld [smem:[#allocation2]] }
 0x133   :  { %281 = vperm.xlu1 %2376, %v263_v0   ;;  %271 = vperm.xlu0 %2375, %v261_v1   ;;  %v2403_v24 = vld [vmem:[#allocation13 + $0x7c] ss:$12 sps:$4 sm:$0xff]   ;;  %v2405_v25 = vld [vmem:[#allocation13 + $0x78] ss:$12 sps:$4 sm:$0xff]   ;;  %v2406_v26 = vld [vmem:[#allocation13 + $0x80] ss:$12 sps:$4 sm:$0xff]  }
 0x134   :  { %v264_v13 = vld [vmem:[%s3686_s30] sm:$0xff]  ;;  %v265_v14 = vld [vmem:[%s3686_s30 + $0x8] sm:$0xff]  ;;  %644 = vmatpush1.bf16.msra.mxu0 %v2389_v10  ;;  %2181 = vmatpush3.bf16.msra.mxu1 %v2390_v11  ;;  %v266_v18 = vld [vmem:[%s3686_s30 + $0x10] sm:$0xf]  ;;  %v3279_v37 = vshrl.u32 %v408_v34, 7  ;;  %s3687_s8 = sld [smem:[#allocation43_spill]] }
 0x135   :  { %645 = vmatprep.subr.bf16.mxu0 %v2391_v12  ;;  %2182 = vmatprep.subr.bf16.mxu1 %v2927_v5  ;;  %v2407_v27 = vld [vmem:[#allocation13 + $0x94] ss:$12 sps:$4 sm:$0xff]   ;;  %v2409_v28 = vld [vmem:[#allocation13 + $0x90] ss:$12 sps:$4 sm:$0xff]   ;;  %v2410_v29 = vld [vmem:[#allocation13 + $0x98] ss:$12 sps:$4 sm:$0xff]  }
 0x136   :  { %v2411_v30 = vld [vmem:[#allocation13 + $0xac] ss:$12 sps:$4 sm:$0xff]   ;;  %v2413_v31 = vld [vmem:[#allocation13 + $0xa8] ss:$12 sps:$4 sm:$0xff]   ;;  %v2414_v32 = vld [vmem:[#allocation13 + $0xb0] ss:$12 sps:$4 sm:$0xff]  }
 0x137   :  { %2377 = vset.pattern.permute.xlu1 %v2928_v8  ;;  %276 = vperm.xlu0 %2375, %v262_v3   ;;  %v2417_v33 = vld [vmem:[#allocation15 + $0x4] ss:$12 sps:$4 sm:$0xff]   ;;  %v2006_v38 = vld [vmem:[#allocation10] ss:$0 sm:$0xff]  ;;  %v3282_v41 = vadd.s32 16, %v3279_v37  ;;  %v3297_v47 = vadd.s32 8, %v3279_v37 }
 0x138   :  { %302 = vperm.xlu1 %2377, %v261_v1   ;;  %646 = vmatpush1.bf16.msra.mxu0 %v2393_v15  ;;  %s437_s28 = sadd.s32 10, %s2012_s10  ;;  %v413_v39 = vstv %s412_s16  ;;  %v2008_v44 = vld [vmem:[#allocation10 + $0x1] ss:$0 sm:$0xff]  ;;  %v2007_v48 = vld [vmem:[#allocation12] ss:$0 sm:$0xff]  ;;  %vm427_vm7 = vcmask 1043456  }
 0x139   :  { %2183 = vmatpush3.bf16.msra.mxu1 %v2394_v16  ;;  %647 = vmatprep.subr.bf16.mxu0 %v2395_v17  ;;  %v438_v40 = vstv %s437_s28  ;;  %vm414_vm1 = vcmp.eq.s32.totalorder %v3279_v37, %v413_v39  ;;  %vm416_vm3 = vcmp.eq.s32.totalorder %v3282_v41, %v413_v39  ;;  %v3301_v51 = vld [vmem:[#allocation7] ss:$0 sm:$0xff]  ;;  %vm415_vm5 = vcmp.eq.s32.totalorder %v3297_v47, %v413_v39  ;;  %s3688_s20 = sld [smem:[#allocation45_spill]]  ;;  %s3689_s4 = sld [smem:[#allocation41_spill]] }
 0x13a   :  { %2184 = vmatprep.subr.bf16.mxu1 %v2927_v5  ;;  %v3287_v42 = vld [vmem:[%s3687_s8] ss:$0 sm:$0xff]  ;;  %vm439_vm2 = vcmp.eq.s32.totalorder %v3279_v37, %v438_v40  ;;  %v2009_v54 = vsel %vm414_vm1, 1.0, %v2927_v5  ;;  %vm441_vm4 = vcmp.eq.s32.totalorder %v3282_v41, %v438_v40  ;;  %v3311_v57 = vld [vmem:[%s3687_s8 + $0x1] ss:$0 sm:$0xff]  ;;  %v2011_v58 = vsel %vm416_vm3, 1.0, %v2927_v5 }
 0x13b   :  { %2378 = vset.pattern.permute.xlu0 %v2928_v8  ;;  %v2013_v55 = vsel %vm439_vm2, 1.0, %v2927_v5  ;;  %vm440_vm6 = vcmp.eq.s32.totalorder %v3297_v47, %v438_v40  ;;  %v2015_v4 = vsel %vm441_vm4, 1.0, %v2927_v5  ;;  %v2010_v9 = vsel %vm415_vm5, 1.0, %v2927_v5  ;;  %v2418_v40 = vld [vmem:[#allocation15 + $0x8] ss:$12 sps:$4 sm:$0xff]  }
 0x13c   :  { %310 = vperm.xlu1 %2377, %v263_v0   ;;  %306 = vperm.xlu0 %2378, %v262_v3   ;;  %v2014_v10 = vsel %vm440_vm6, 1.0, %v2927_v5  ;;  %vm460_vm8 = vcmask 1040384   ;;  %vm1340_vm9 = vcmp.lt.s32.totalorder %v3297_v47, 10  ;;  %vm1362_vm10 = vcmp.ge.s32.totalorder %v3297_v47, 10 }
 0x13d   :  { %648 = vmatpush1.bf16.msra.mxu0 %v2397_v19  ;;  %2185 = vmatpush3.bf16.msra.mxu1 %v2398_v20  ;;  %vm1366_vm11 = vcmp.lt.s32.totalorder %v3282_v41, 20  ;;  %vm1432_vm13 = vcmask 7168   ;;  %vm1436_vm14 = vcmask 3072  }
 0x13e   :  { %649 = vmatprep.subr.bf16.mxu0 %v2399_v21  ;;  %2186 = vmatprep.subr.bf16.mxu1 %v2927_v5 }
 0x140   :  { %2379 = vset.pattern.permute.xlu1 %v2926_v2  ;;  %2380 = vset.pattern.permute.xlu0 %v2926_v2 }
 0x141   :  { %327 = vperm.xlu1 %2379, %v264_v13   ;;  %332 = vperm.xlu0 %2380, %v265_v14  }
 0x142   :  { %650 = vmatpush1.bf16.msra.mxu0 %v2401_v22  ;;  %2187 = vmatpush3.bf16.msra.mxu1 %v2402_v23 }
 0x143   :  { %651 = vmatprep.subr.bf16.mxu0 %v2403_v24  ;;  %2188 = vmatprep.subr.bf16.mxu1 %v2927_v5 }
 0x145   :  { %337 = vperm.xlu1 %2379, %v266_v18   ;;  %2382 = vset.pattern.permute.xlu0 %v2928_v8 }
 0x146   :  { %362 = vperm.xlu0 %2382, %v265_v14   ;;  %652 = vmatpush1.bf16.msra.mxu0 %v2405_v25 }
 0x147   :  { %2189 = vmatpush3.bf16.msra.mxu1 %v2406_v26  ;;  %653 = vmatprep.subr.bf16.mxu0 %v2407_v27 }
 0x148   :  { %2190 = vmatprep.subr.bf16.mxu1 %v2927_v5 }
 0x149   :  { %2381 = vset.pattern.permute.xlu1 %v2928_v8 }
 0x14a   :  { %358 = vperm.xlu1 %2381, %v264_v13   ;;  %654 = vmatpush1.bf16.msra.mxu0 %v2409_v28 }
 0x14b   :  { %2191 = vmatpush3.bf16.msra.mxu1 %v2410_v29  ;;  %655 = vmatprep.subr.bf16.mxu0 %v2411_v30 }
 0x14c   :  { %2192 = vmatprep.subr.bf16.mxu1 %v2927_v5 }
 0x14e   :  { %366 = vperm.xlu1 %2381, %v266_v18   ;;  %656 = vmatpush1.bf16.msra.mxu0 %v2413_v31 }
 0x14f   :  { %2193 = vmatpush3.bf16.msra.mxu1 %v2414_v32  ;;  %900 = vmatprep.subr.bf16.mxu0 %v2417_v33 }
 0x150   :  { %2198 = vmatprep.subr.bf16.mxu1 %v2927_v5 }
 0x1b2   :  { %v3277_v35 = vpop.permute.xlu0 %271  ;;  %v282_v36 = vpop.permute.xlu1 %281 }
 0x1b3   :  { %v385_v45 = vmul.f32 %v2006_v38, %v3277_v35  ;;  %v290_v49 = vmul.f32 %v3287_v42, %v282_v36  ;;  %v387_v50 = vmul.f32 %v2006_v38, %v282_v36 }
 0x1b5   :  { %v394_v56 = vadd.f32 %v2007_v48, %v385_v45  ;;  %v299_v61 = vadd.f32 %v3301_v51, %v290_v49  ;;  %v396_v62 = vadd.f32 %v2007_v48, %v387_v50  ;;  %v2421_v45 = vld [vmem:[#allocation15 + $0x1c] ss:$12 sps:$4 sm:$0xff]   ;;  %v2422_v49 = vld [vmem:[#allocation15 + $0x20] ss:$12 sps:$4 sm:$0xff]  }
 0x1b6   :  { %v3289_v43 = vpop.permute.xlu0 %276  ;;  %v2425_v50 = vld [vmem:[#allocation15 + $0x34] ss:$12 sps:$4 sm:$0xff]  }
 0x1b7   :  { %v3294_v46 = vpop.permute.xlu1 %302  ;;  %v386_v52 = vmul.f32 %v2006_v38, %v3289_v43  ;;  %v2415_v38 = vld [vmem:[#allocation15] ss:$12 sps:$4 sm:$0xff]  }
 0x1b8   :  { %v402_v53 = vmul.f32 %v2008_v44, %v3294_v46 }
 0x1b9   :  { %v395_v1 = vadd.f32 %v2007_v48, %v386_v52  ;;  %v2419_v48 = vld [vmem:[#allocation15 + $0x18] ss:$12 sps:$4 sm:$0xff]   ;;  %v2423_v52 = vld [vmem:[#allocation15 + $0x30] ss:$12 sps:$4 sm:$0xff]  }
 0x1ba   :  { %v405_v3 = vadd.f32 %v402_v53, %v394_v56  ;;  %v2426_v53 = vld [vmem:[#allocation15 + $0x38] ss:$12 sps:$4 sm:$0xff]   ;;  %v2430_v56 = vld [vmem:[#allocation15 + $0x50] ss:$12 sps:$4 sm:$0xff]  }
 0x1bb   :  { %v311_v59 = vpop.permute.xlu1 %310  ;;  %v3316_v60 = vpop.permute.xlu0 %306 }
 0x1bc   :  { %v319_v63 = vmul.f32 %v3311_v57, %v311_v59  ;;  %v404_v0 = vmul.f32 %v2008_v44, %v311_v59  ;;  %v403_v6 = vmul.f32 %v2008_v44, %v3316_v60  ;;  %v423_v14 = vmul.f32 %v2009_v54, %v405_v3  ;;  %v2429_v54 = vld [vmem:[#allocation15 + $0x4c] ss:$12 sps:$4 sm:$0xff]  }
 0x1bd   :  { %v448_v15 = vmul.f32 %v2013_v55, %v405_v3  ;;  %v2427_v55 = vld [vmem:[#allocation15 + $0x48] ss:$12 sps:$4 sm:$0xff]   ;;  %v2431_v59 = vld [vmem:[#allocation15 + $0x60] ss:$12 sps:$4 sm:$0xff]   ;;  %v2435_v3 = vld [vmem:[#allocation15 + $0x78] ss:$12 sps:$4 sm:$0xff]  }
 0x1be   :  { %v3322_v7 = vadd.f32 %v319_v63, %v299_v61  ;;  %v407_v8 = vadd.f32 %v404_v0, %v396_v62  ;;  %v406_v11 = vadd.f32 %v403_v6, %v395_v1  ;;  %v2434_v61 = vld [vmem:[#allocation15 + $0x68] ss:$12 sps:$4 sm:$0xff]  }
 0x1bf   :  { %v2437_v62 = vld [vmem:[#allocation15 + $0x7c] ss:$12 sps:$4 sm:$0xff]   ;;  %v3339_v0 = vld [vmem:[%s3688_s20] ss:$0 sm:$0xff] }
 0x1c0   :  { %v425_v12 = vmul.f32 %v2011_v58, %v407_v8  ;;  %v450_v13 = vmul.f32 %v2015_v4, %v407_v8  ;;  %v424_v16 = vmul.f32 %v2010_v9, %v406_v11  ;;  %v449_v17 = vmul.f32 %v2014_v10, %v406_v11  ;;  %v2433_v58 = vld [vmem:[#allocation15 + $0x64] ss:$12 sps:$4 sm:$0xff]   ;;  %v333_v63 = vpop.permute.xlu0 %332  ;;  %v2438_v4 = vld [vmem:[#allocation15 + $0x80] ss:$12 sps:$4 sm:$0xff]   ;;  %v3346_v10 = vld [vmem:[#allocation9] ss:$0 sm:$0xff] }
 0x1c1   :  { %v2441_v6 = vld [vmem:[#allocation15 + $0x94] ss:$12 sps:$4 sm:$0xff]   ;;  %v345_v9 = vmul.f32 %v3339_v0, %v333_v63 }
 0x1c2   :  { %v428_v18 = vsel %vm427_vm7, %v425_v12, 0.0  ;;  %v452_v19 = vsel %vm427_vm7, %v450_v13, 0.0  ;;  %v426_v20 = vadd.f32 %v424_v16, %v423_v14  ;;  %v451_v21 = vadd.f32 %v449_v17, %v448_v15  ;;  %v3351_v11 = vld [vmem:[%s3688_s20 + $0x1] ss:$0 sm:$0xff]  ;;  %v2439_v13 = vld [vmem:[#allocation15 + $0x90] ss:$12 sps:$4 sm:$0xff]  }
 0x1c3   :  { %v2442_v14 = vld [vmem:[#allocation15 + $0x98] ss:$12 sps:$4 sm:$0xff]   ;;  %v289_v15 = vmul.f32 %v3287_v42, %v3289_v43  ;;  %v2443_v43 = vld [vmem:[#allocation15 + $0xa8] ss:$12 sps:$4 sm:$0xff]   ;;  %s2931_s20 = smov [#allocation27]  }
 0x1c4   :  { %v429_v22 = vadd.f32 %v428_v18, %v426_v20  ;;  %v453_v23 = vadd.f32 %v452_v19, %v451_v21  ;;  %v2445_v16 = vld [vmem:[#allocation15 + $0xac] ss:$12 sps:$4 sm:$0xff]   ;;  %v354_v19 = vadd.f32 %v3346_v10, %v345_v9  ;;  %v2464_v63 = vld [vmem:[#allocation21 + $0x8] sm:$0xff]   ;;  %s1979_s13 = sshll.u32 %s2931_s20, 4  ;;  %s1980_s13 = int_to_ptr.vmem [resolvable:$true] %s1979_s13 }
 0x1c5   :  { %v363_v12 = vpop.permute.xlu0 %362  ;;  %v3431_v9 = vld [vmem:[%s3654_s19] sm:$0xff]   ;;  %s2865_s21 = scalar_lea.vmem %s1980_s13, 32  ;;  %p2870_p6 = scmp.lt.s32.totalorder %s1980_s13, %s1980_s13 }
 0x1c6   :  { %v430_v24 = vrot.slane %v429_v22, 4  ;;  %v454_v25 = vrot.slane %v453_v23, 4  ;;  %v374_v21 = vmul.f32 %v3351_v11, %v363_v12  ;;  %p2866_p5 = scmp.ne.s32.totalorder %s1980_s13, %s2865_s21  ;;  %p2871_p7 = scmp.lt.s32.totalorder %s2865_s21, %s2865_s21 }
 0x1c8   :  { %v431_v26 = vadd.f32 %v430_v24, %v429_v22  ;;  %v455_v27 = vadd.f32 %v454_v25, %v453_v23  ;;  %v288_v22 = vmul.f32 %v3287_v42, %v3277_v35  ;;  %v318_v23 = vmul.f32 %v3311_v57, %v3316_v60  ;;  %v2446_v24 = vld [vmem:[#allocation15 + $0xb0] ss:$12 sps:$4 sm:$0xff]   ;;  %v3364_v25 = vld [vmem:[#allocation6] sm:$0x3]  ;;  %p2872_p8 = por %p2871_p7, %p2870_p6 }
 0x1c9   :  { %v2448_v35 = vld [vmem:[%s3650_s15] sm:$0xff]   ;;  %v377_v60 = vadd.f32 %v374_v21, %v354_v19 }
 0x1ca   :  { %v432_v28 = vrot.slane %v431_v26, 2  ;;  %v456_v29 = vrot.slane %v455_v27, 2  ;;  %p2873_p9 = pnand %p2872_p8, %p2866_p5 }
 0x1cc   :  { %v433_v30 = vadd.f32 %v432_v28, %v431_v26  ;;  %v457_v31 = vadd.f32 %v456_v29, %v455_v27  ;;  %v298_v26 = vadd.f32 %v3301_v51, %v289_v15  ;;  %v317_v27 = vmul.f32 %v3311_v57, %v3294_v46  ;;  %v2447_v28 = vld [vmem:[#allocation19] sm:$0xff]   ;;  %v2449_v57 = vld [vmem:[#allocation19 + $0x8] sm:$0xff]   ;;  %v755_v15 = vld [vmem:[#allocation18] sm:$0x7] }
 0x1cd   :  { %v297_v29 = vadd.f32 %v3301_v51, %v288_v22 }
 0x1ce   :  { %v434_v32 = vrot.slane %v433_v30, 1  ;;  %v458_v33 = vrot.slane %v457_v31, 1 }
 0x1cf   :  { %v3378_v46 = vadd.f32 %v317_v27, %v297_v29 }
 0x1d0   :  { %v435_v34 = vadd.f32 %v434_v32, %v433_v30  ;;  %v459_v36 = vadd.f32 %v458_v33, %v457_v31  ;;  %v3374_v30 = vadd.f32 %v318_v23, %v298_v26  ;;  %v722_v31 = vpack.c.bf16 %v3364_v25, %v3364_v25  ;;  %v2450_v32 = vld [vmem:[%s3650_s15 + $0x8] sm:$0xff]  }
 0x1d2   :  { %v461_v39 = vsel %vm460_vm8, %v435_v34, %v459_v36  ;;  %v3385_v51 = vpack.c.bf16 %v3374_v30, %v3378_v46  ;;  %v2451_v34 = vld [vmem:[#allocation19 + $0x10] sm:$0xff]   ;;  %v2452_v36 = vld [vmem:[%s3650_s15 + $0x10] sm:$0xff]  }
 0x1d3   :  { %v463_v44 = vpack.c.bf16 %v461_v39, %v461_v39  ;;  %v2454_v39 = vld [vmem:[%s3650_s15 + $0x18] sm:$0xff]  }
 0x1d5   :  { %674 = vmatmul.mubr.bf16.vlgmr.msra.gmra.mrb[0].mxu0 %v463_v44  ;;  %2195 = vmatmul.mubr.bf16.vlgmr.msra.gmra.mrb[0].mxu1 %v463_v44  ;;  %v2456_v44 = vld [vmem:[%s3650_s15 + $0x20] sm:$0xff]  }
 0x1d6   :  { %901 = vmatpush1.bf16.msra.mxu0 %v2415_v38  ;;  %2199 = vmatpush3.bf16.msra.mxu1 %v2418_v40  ;;  %v2453_v38 = vld [vmem:[#allocation19 + $0x18] sm:$0xff]   ;;  %v2455_v40 = vld [vmem:[#allocation19 + $0x20] sm:$0xff]  }
 0x1d7   :  { %902 = vmatprep.subr.bf16.mxu0 %v2421_v45  ;;  %2200 = vmatprep.subr.bf16.mxu1 %v2927_v5  ;;  %v2457_v45 = vld [vmem:[#allocation19 + $0x28] sm:$0xff]  }
 0x1d8   :  { %932 = vmatprep.mubr.bf16.mxu0 %v2926_v2  ;;  %2214 = vmatprep.mubr.msk.bf16.mxu1 %vm2929_vm0, %v2927_v5  ;;  %v328_v2 = vpop.permute.xlu1 %327 }
 0x1d9   :  { %v344_v8 = vmul.f32 %v3339_v0, %v328_v2 }
 0x1da   :  { %903 = vmatpush1.bf16.msra.mxu0 %v2419_v48  ;;  %2201 = vmatpush3.bf16.msra.mxu1 %v2422_v49  ;;  %v2458_v48 = vld [vmem:[%s3650_s15 + $0x28] sm:$0xff]  }
 0x1db   :  { %904 = vmatprep.subr.bf16.mxu0 %v2425_v50  ;;  %2202 = vmatprep.subr.bf16.mxu1 %v2927_v5  ;;  %v353_v18 = vadd.f32 %v3346_v10, %v344_v8  ;;  %v2470_v8 = vld [vmem:[#allocation21 + $0x38] sm:$0xff]  }
 0x1dc   :  { %v3341_v1 = vpop.permute.xlu1 %337 }
 0x1dd   :  { %v346_v49 = vmul.f32 %v3339_v0, %v3341_v1  ;;  %v2465_v0 = vld [vmem:[#allocation21 + $0x10] sm:$0xff]   ;;  %v2466_v1 = vld [vmem:[#allocation21 + $0x18] sm:$0xff]  }
 0x1de   :  { %905 = vmatpush1.bf16.msra.mxu0 %v2423_v52  ;;  %2203 = vmatpush3.bf16.msra.mxu1 %v2426_v53  ;;  %v2459_v52 = vld [vmem:[#allocation19 + $0x30] sm:$0xff]   ;;  %v2460_v53 = vld [vmem:[%s3650_s15 + $0x30] sm:$0xff]  }
 0x1df   :  { %906 = vmatprep.subr.bf16.mxu0 %v2429_v54  ;;  %2204 = vmatprep.subr.bf16.mxu1 %v2927_v5  ;;  %v355_v54 = vadd.f32 %v3346_v10, %v346_v49 }
 0x1e0   :  { %v359_v17 = vpop.permute.xlu1 %358 }
 0x1e1   :  { %v373_v20 = vmul.f32 %v3351_v11, %v359_v17  ;;  %v3438_v17 = vsub.s32 1, %v3279_v37 }
 0x1e2   :  { %907 = vmatpush1.bf16.msra.mxu0 %v2427_v55  ;;  %2205 = vmatpush3.bf16.msra.mxu1 %v2430_v56  ;;  %v2461_v56 = vld [vmem:[#allocation19 + $0x38] sm:$0xff]  }
 0x1e3   :  { %908 = vmatprep.subr.bf16.mxu0 %v2433_v58  ;;  %2206 = vmatprep.subr.bf16.mxu1 %v2927_v5  ;;  %v376_v42 = vadd.f32 %v373_v20, %v353_v18  ;;  %v2462_v58 = vld [vmem:[%s3650_s15 + $0x38] sm:$0xff]   ;;  %v764_v21 = vrot.slane %v755_v15, %v3438_v17 }
 0x1e4   :  { %v367_v50 = vpop.permute.xlu1 %366 }
 0x1e5   :  { %v1021_v33 = vpack.c.bf16 %v377_v60, %v376_v42  ;;  %v375_v55 = vmul.f32 %v3351_v11, %v367_v50 }
 0x1e6   :  { %909 = vmatpush1.bf16.msra.mxu0 %v2431_v59  ;;  %2207 = vmatpush3.bf16.msra.mxu1 %v2434_v61  ;;  %v3412_v61 = vpack.c.bf16 %v3322_v7, %v3322_v7 }
 0x1e7   :  { %910 = vmatprep.subr.bf16.mxu0 %v2437_v62  ;;  %2208 = vmatprep.subr.bf16.mxu1 %v2927_v5  ;;  %v378_v2 = vadd.f32 %v375_v55, %v355_v54  ;;  %v2463_v62 = vld [vmem:[#allocation21] sm:$0xff]  }
 0x1e9   :  { %v1022_v59 = vpack.c.bf16 %v378_v2, %v378_v2 }
 0x1ea   :  { %911 = vmatpush1.bf16.msra.mxu0 %v2435_v3  ;;  %2209 = vmatpush3.bf16.msra.mxu1 %v2438_v4  ;;  %v2467_v3 = vld [vmem:[#allocation21 + $0x20] sm:$0xff]   ;;  %v2468_v4 = vld [vmem:[#allocation21 + $0x28] sm:$0xff]  }
 0x1eb   :  { %912 = vmatprep.subr.bf16.mxu0 %v2441_v6  ;;  %2210 = vmatprep.subr.bf16.mxu1 %v2927_v5  ;;  %v2469_v6 = vld [vmem:[#allocation21 + $0x30] sm:$0xff]  }
 0x1ee   :  { %913 = vmatpush1.bf16.msra.mxu0 %v2439_v13  ;;  %2211 = vmatpush3.bf16.msra.mxu1 %v2442_v14  ;;  %v3435_v14 = vsub.s32 0, %v3279_v37 }
 0x1ef   :  { %914 = vmatprep.subr.bf16.mxu0 %v2445_v16  ;;  %2212 = vmatprep.subr.bf16.mxu1 %v2927_v5  ;;  %v496_v16 = vld [vmem:[#allocation16] sm:$0x7] }
 0x1f0   :  { %v501_v18 = vrot.slane %v496_v16, %v3435_v14  ;;  %v760_v19 = vrot.slane %v755_v15, %v3435_v14  ;;  %v505_v20 = vrot.slane %v496_v16, %v3438_v17 }
 0x1f2   :  { %915 = vmatpush1.bf16.msra.mxu0 %v2443_v43  ;;  %2213 = vmatpush3.bf16.msra.mxu1 %v2446_v24  ;;  %v2318_v22 = vadd.f32 %v760_v19, %v501_v18  ;;  %v2320_v43 = vadd.f32 %v764_v21, %v505_v20  ;;  %v2478_v18 = vld [vmem:[%s3654_s19 + $0x38] sm:$0xff]   ;;  %v3474_v20 = vsel %vm1340_vm9, 1.0, %v2927_v5 }
 0x1f3   :  { %2218 = vmatprep.subr.bf16.mxu0 %v2447_v28  ;;  %2238 = vmatprep.subr.bf16.mxu1 %v2448_v35  ;;  %vm1407_vm12 = vcmp.gt.f32.partialorder %v3474_v20, 0.0 }
 0x1f5   :  { %933 = vmatmul.mubr.bf16.vlgmr.msra.gmra.mrb[0].mxu0 %v722_v31  ;;  %2215 = vmatmul.mubr.bf16.vlgmr.msra.gmra.mrb[4].mxu1 %v722_v31 }
 0x1f6   :  { %2219 = vmatpush3.bf16.msra.mxu0 %v2447_v28  ;;  %2239 = vmatpush3.bf16.msra.mxu1 %v2448_v35 }
 0x1f7   :  { %2254 = vmatprep.mubr.bf16.mxu1 %v3385_v51  ;;  %2220 = vmatprep.subr.bf16.mxu0 %v2449_v57 }
 0x1f8   :  { %2240 = vmatprep.subr.bf16.mxu1 %v2450_v32  ;;  %2234 = vmatprep.mubr.bf16.mxu0 %v1021_v33 }
 0x1fa   :  { %2221 = vmatpush3.bf16.msra.mxu0 %v2449_v57  ;;  %2241 = vmatpush3.bf16.msra.mxu1 %v2450_v32 }
 0x1fb   :  { %2222 = vmatprep.subr.bf16.mxu0 %v2451_v34  ;;  %2242 = vmatprep.subr.bf16.mxu1 %v2452_v36 }
 0x1fe   :  { %2223 = vmatpush3.bf16.msra.mxu0 %v2451_v34  ;;  %2243 = vmatpush3.bf16.msra.mxu1 %v2452_v36  ;;  %v508_v36 = vsub.s32 2, %v3279_v37 }
 0x1ff   :  { %2224 = vmatprep.subr.bf16.mxu0 %v2453_v38  ;;  %2244 = vmatprep.subr.bf16.mxu1 %v2454_v39 }
 0x202   :  { %2225 = vmatpush3.bf16.msra.mxu0 %v2453_v38  ;;  %2245 = vmatpush3.bf16.msra.mxu1 %v2454_v39  ;;  %v768_v38 = vrot.slane %v755_v15, %v508_v36  ;;  %v2473_v15 = vld [vmem:[%s3654_s19 + $0x10] sm:$0xff]  }
 0x203   :  { %2226 = vmatprep.subr.bf16.mxu0 %v2455_v40  ;;  %2246 = vmatprep.subr.bf16.mxu1 %v2456_v44 }
 0x206   :  { %2227 = vmatpush3.bf16.msra.mxu0 %v2455_v40  ;;  %2247 = vmatpush3.bf16.msra.mxu1 %v2456_v44  ;;  %v509_v40 = vrot.slane %v496_v16, %v508_v36  ;;  %v2475_v16 = vld [vmem:[%s3654_s19 + $0x20] sm:$0xff]   ;;  %v2093_v36 = vld [vmem:[#allocation22] ss:$0 sm:$0xff] }
 0x207   :  { %2228 = vmatprep.subr.bf16.mxu0 %v2457_v45  ;;  %2248 = vmatprep.subr.bf16.mxu1 %v2458_v48 }
 0x20a   :  { %2229 = vmatpush3.bf16.msra.mxu0 %v2457_v45  ;;  %2249 = vmatpush3.bf16.msra.mxu1 %v2458_v48 }
 0x20b   :  { %2230 = vmatprep.subr.bf16.mxu0 %v2459_v52  ;;  %2250 = vmatprep.subr.bf16.mxu1 %v2460_v53 }
 0x20e   :  { %2231 = vmatpush3.bf16.msra.mxu0 %v2459_v52  ;;  %2251 = vmatpush3.bf16.msra.mxu1 %v2460_v53 }
 0x20f   :  { %2232 = vmatprep.subr.bf16.mxu0 %v2461_v56  ;;  %2252 = vmatprep.subr.bf16.mxu1 %v2462_v58 }
 0x212   :  { %2233 = vmatpush3.bf16.msra.mxu0 %v2461_v56  ;;  %2253 = vmatpush3.bf16.msra.mxu1 %v2462_v58 }
 0x213   :  { %2258 = vmatprep.subr.bf16.mxu0 %v2927_v5  ;;  %2278 = vmatprep.subr.bf16.mxu1 %v2927_v5 }
 0x215   :  { %2235 = vmatmul.mubr.bf16.vlgmr.msra.gmra.mrb[4].mxu0 %v1022_v59  ;;  %2255 = vmatmul.mubr.bf16.vlgmr.msra.gmra.mrb[8].mxu1 %v3412_v61 }
 0x216   :  { %2274 = vmatprep.mubr.msk.bf16.mxu0 %vm2929_vm0, %v2927_v5  ;;  %2294 = vmatprep.mubr.msk.bf16.mxu1 %vm2929_vm0, %v2927_v5 }
 0x217   :  { %2259 = vmatpush3.bf16.msra.mxu0 %v2463_v62 }
 0x218   :  { %2260 = vmatprep.subr.bf16.mxu0 %v2927_v5 }
 0x21b   :  { %2261 = vmatpush3.bf16.msra.mxu0 %v2464_v63 }
 0x21c   :  { %2262 = vmatprep.subr.bf16.mxu0 %v2927_v5 }
 0x21f   :  { %2263 = vmatpush3.bf16.msra.mxu0 %v2465_v0 }
 0x220   :  { %2264 = vmatprep.subr.bf16.mxu0 %v2927_v5 }
 0x223   :  { %2265 = vmatpush3.bf16.msra.mxu0 %v2466_v1 }
 0x224   :  { %2266 = vmatprep.subr.bf16.mxu0 %v2927_v5 }
 0x227   :  { %2267 = vmatpush3.bf16.msra.mxu0 %v2467_v3 }
 0x228   :  { %2268 = vmatprep.subr.bf16.mxu0 %v2927_v5 }
 0x22b   :  { %2269 = vmatpush3.bf16.msra.mxu0 %v2468_v4 }
 0x22c   :  { %2270 = vmatprep.subr.bf16.mxu0 %v2927_v5 }
 0x22f   :  { %2271 = vmatpush3.bf16.msra.mxu0 %v2469_v6 }
 0x230   :  { %2272 = vmatprep.subr.bf16.mxu0 %v2927_v5 }
 0x233   :  { %2273 = vmatpush3.bf16.msra.mxu0 %v2470_v8 }
 0x234   :  { %2298 = vmatprep.subr.bf16.mxu0 %v3431_v9 }
 0x2a8   :  { %v716_v10 = vpop.f32.mrb[0].mxu1 }
 0x2a9   :  { %v2196_v11 = vpop.f32.mrb[1].mxu1  ;;  %v717_v49 = vadd.f32 %v716_v10, %v509_v40 }
 0x2aa   :  { %v719_v12 = vpop.f32.mrb[2].mxu1 }
 0x2ab   :  { %v2197_v13 = vpop.f32.mrb[3].mxu1 }
 0x2ac   :  { %v2472_v13 = vld [vmem:[%s3654_s19 + $0x8] sm:$0xff]  }
 0x2c8   :  { %v934_v23 = vpop.f32.mrb[0].mxu0  ;;  %v975_v24 = vpop.f32.mrb[4].mxu1 }
 0x2c9   :  { %v2319_v26 = vadd.f32 %v2318_v22, %v934_v23  ;;  %v936_v27 = vpop.f32.mrb[1].mxu0  ;;  %v2216_v28 = vpop.f32.mrb[5].mxu1  ;;  %v976_v45 = vadd.f32 %v975_v24, %v768_v38  ;;  %v3478_v22 = vsel %vm1362_vm10, 1.0, %v2927_v5 }
 0x2ca   :  { %v938_v35 = vpop.f32.mrb[2].mxu0  ;;  %v978_v42 = vpop.f32.mrb[6].mxu1  ;;  %v2321_v57 = vadd.f32 %v2320_v43, %v936_v27  ;;  %vm1466_vm15 = vcmp.gt.f32.partialorder %v3478_v22, 0.0 }
 0x2cb   :  { %v2064_v60 = vmul.f32 -1.442695, %v2319_v26  ;;  %v939_v29 = vpop.f32.mrb[3].mxu0  ;;  %v2217_v31 = vpop.f32.mrb[7].mxu1 }
 0x2cc   :  { %v2065_v32 = vmul.f32 -1.442695, %v2321_v57 }
 0x2cd   :  { %2487 = vpow2.f32 %v2064_v60 }
 0x2ce   :  { %2489 = vpow2.f32 %v2065_v32 }
 0x2d7   :  { %v2488_v33 = vpop.eup %2487 }
 0x2d8   :  { %v985_v34 = vadd.f32 1.0, %v2488_v33  ;;  %v2490_v39 = vpop.eup %2489 }
 0x2d9   :  { %v992_v44 = vadd.f32 1.0, %v2490_v39 }
 0x2da   :  { %2491 = vrcp.f32 %v985_v34 }
 0x2db   :  { %2493 = vrcp.f32 %v992_v44 }
 0x2e4   :  { %v2492_v48 = vpop.eup %2491 }
 0x2e5   :  { %v995_v50 = vmul.f32 %v2492_v48, %v976_v45  ;;  %v2494_v3 = vpop.eup %2493 }
 0x2e6   :  { %v998_v4 = vsub.f32 1.0, %v2494_v3  ;;  %v1000_v10 = vmul.f32 %v2494_v3, %v3364_v25  ;;  %v2474_v25 = vld [vmem:[%s3654_s19 + $0x18] sm:$0xff]  }
 0x2e7   :  { %v996_v52 = vadd.f32 %v995_v50, %v717_v49 }
 0x2e8   :  { %v2236_v53 = vpop.f32.mrb[4].mxu0  ;;  %v2256_v54 = vpop.f32.mrb[8].mxu1 }
 0x2e9   :  { %2495 = vtanh.f32 %v996_v52  ;;  %v1226_v55 = vadd.f32 %v2256_v54, %v2236_v53  ;;  %v1121_v56 = vpop.f32.mrb[5].mxu0  ;;  %v1217_v58 = vpop.f32.mrb[9].mxu1 }
 0x2ea   :  { %v1218_v2 = vadd.f32 %v1217_v58, %v1121_v56  ;;  %v2237_v59 = vpop.f32.mrb[6].mxu0  ;;  %v2257_v62 = vpop.f32.mrb[10].mxu1  ;;  %v2930_v58 = vmov -inf  }
 0x2eb   :  { %v1124_v63 = vpop.f32.mrb[7].mxu0  ;;  %v1220_v0 = vpop.f32.mrb[11].mxu1 }
 0x2ec   :  { %v1221_v1 = vadd.f32 %v1220_v0, %v1124_v63 }
 0x2f3   :  { %v2496_v6 = vpop.eup %2495 }
 0x2f4   :  { %v999_v8 = vmul.f32 %v2496_v6, %v998_v4 }
 0x2f6   :  { %v1001_v11 = vadd.f32 %v1000_v10, %v999_v8 }
 0x2f8   :  { %v1231_v12 = vpack.c.bf16 %v1001_v11, %v1001_v11  ;;  %1002 = vst [vmem:[#allocation27] sm:$0x3] %v1001_v11 }
 0x2fa   :  { %2275 = vmatmul.mubr.bf16.vlgmr.msra.gmra.mrb[8].mxu0 %v1231_v12 }
 0x2fb   :  { %2299 = vmatpush3.bf16.msra.mxu0 %v3431_v9  ;;  %2314 = vmatprep.mubr.bf16.mxu0 %v3385_v51  ;;  %v2476_v51 = vld [vmem:[%s3654_s19 + $0x28] sm:$0xff]   ;;  %v2477_v9 = vld [vmem:[%s3654_s19 + $0x30] sm:$0xff]  }
 0x2fc   :  { %2300 = vmatprep.subr.bf16.mxu0 %v2472_v13 }
 0x2ff   :  { %2301 = vmatpush3.bf16.msra.mxu0 %v2472_v13 }
 0x300   :  { %2302 = vmatprep.subr.bf16.mxu0 %v2473_v15 }
 0x303   :  { %2303 = vmatpush3.bf16.msra.mxu0 %v2473_v15 }
 0x304   :  { %2304 = vmatprep.subr.bf16.mxu0 %v2474_v25 }
 0x307   :  { %2305 = vmatpush3.bf16.msra.mxu0 %v2474_v25 }
 0x308   :  { %2306 = vmatprep.subr.bf16.mxu0 %v2475_v16 }
 0x30b   :  { %2307 = vmatpush3.bf16.msra.mxu0 %v2475_v16 }
 0x30c   :  { %2308 = vmatprep.subr.bf16.mxu0 %v2476_v51 }
 0x30f   :  { %2309 = vmatpush3.bf16.msra.mxu0 %v2476_v51 }
 0x310   :  { %2310 = vmatprep.subr.bf16.mxu0 %v2477_v9 }
 0x313   :  { %2311 = vmatpush3.bf16.msra.mxu0 %v2477_v9 }
 0x314   :  { %2312 = vmatprep.subr.bf16.mxu0 %v2478_v18 }
 0x317   :  { %2313 = vmatpush3.bf16.msra.mxu0 %v2478_v18 }
 0x31a   :  { %2315 = vmatmul.mubr.bf16.vlgmr.msra.gmra.mrb[12].mxu0 %v3412_v61  ;;  %v3482_v61 = vsel %vm1366_vm11, 1.0, %v2927_v5 }
 0x31b   :  { %vm1467_vm0 = vcmp.gt.f32.partialorder %v3482_v61, 0.0 }
 0x3cd   :  { %v1330_v19 = vpop.f32.mrb[8].mxu0 }
 0x3ce   :  { %v1354_v21 = vrot.slane %v1330_v19, %v3435_v14  ;;  %v1379_v23 = vrot.slane %v1330_v19, %v3438_v17  ;;  %v2276_v43 = vpop.f32.mrb[9].mxu0 }
 0x3cf   :  { %v1333_v24 = vpop.f32.mrb[10].mxu0 }
 0x3d0   :  { %v1356_v26 = vmul.f32 %v3474_v20, %v1354_v21  ;;  %v1357_v27 = vmul.f32 0.0, %v1354_v21  ;;  %v1358_v28 = vadd.f32 %v1354_v21, %v1218_v2  ;;  %v1380_v35 = vmul.f32 0.0, %v1379_v23  ;;  %v2277_v42 = vpop.f32.mrb[11].mxu0 }
 0x3d1   :  { %v1381_v60 = vmul.f32 %v3478_v22, %v1379_v23  ;;  %v1382_v57 = vmul.f32 %v3482_v61, %v1379_v23  ;;  %v1412_v2 = vsel %vm427_vm7, -1e+30, %v2930_v58 }
 0x3d2   :  { %v1359_v29 = vadd.f32 %v1356_v26, %v1221_v1  ;;  %v1360_v31 = vadd.f32 %v1357_v27, %v1226_v55  ;;  %v1383_v32 = vadd.f32 %v1380_v35, %v1358_v28 }
 0x3d4   :  { %v1384_v33 = vadd.f32 %v1381_v60, %v1359_v29  ;;  %v1385_v34 = vadd.f32 %v1382_v57, %v1360_v31  ;;  %2497 = vtanh.f32 %v1383_v32 }
 0x3d6   :  { %2499 = vtanh.f32 %v1384_v33 }
 0x3d7   :  { %2501 = vtanh.f32 %v1385_v34 }
 0x3de   :  { %v2498_v38 = vpop.eup %2497 }
 0x3df   :  { %v1396_v39 = vmul.f32 %v2498_v38, %v2093_v36 }
 0x3e0   :  { %v2500_v40 = vpop.eup %2499 }
 0x3e1   :  { %v2502_v44 = vpop.eup %2501  ;;  %1399 = vadd.xlane.f32.xlu0 %v1396_v39  ;;  %v1397_v45 = vmul.f32 %v2500_v40, %v2093_v36 }
 0x3e2   :  { %v1398_v48 = vmul.f32 %v2502_v44, %v2093_v36 }
 0x3e3   :  { %1401 = vadd.xlane.f32.xlu1 %v1397_v45 }
 0x3e4   :  { %v1403_v49 = vsel %vm427_vm7, %v1398_v48, 0.0 }
 0x3e5   :  { %1404 = vadd.xlane.f32.xlu0 %v1403_v49 }
 0x3ed   :  { %v3488_v50 = vpop.f32.mrb[12].mxu0 }
 0x3ee   :  { %v3490_v52 = vpop.f32.mrb[13].mxu0 }
 0x3ef   :  { %v2317_v53 = vpop.f32.mrb[14].mxu0 }
 0x3f0   :  { %v3492_v54 = vpop.f32.mrb[15].mxu0 }
 0x46e   :  { %v1400_v56 = vpop.xlane.xlu0 %1399 }
 0x470   :  { %v1402_v55 = vpop.xlane.xlu1 %1401 }
 0x471   :  { %v1410_v59 = vsel %vm1407_vm12, %v1402_v55, -1e+30  ;;  %v1469_v27 = vsel %vm1466_vm15, %v1402_v55, -1e+30 }
 0x472   :  { %v1413_v62 = vmax.f32 %v1400_v56, %v1410_v59  ;;  %v1405_v26 = vpop.xlane.xlu0 %1404  ;;  %v1472_v35 = vmax.f32 %v1469_v27, -1e+30 }
 0x473   :  { %v1470_v28 = vsel %vm1467_vm0, %v1405_v26, -1e+30  ;;  %vm1965_vm0 = vcmask 1024  }
 0x474   :  { %v1414_v63 = vmax.f32 %v1413_v62, %v1412_v2  ;;  %v1471_v42 = vsel %vm427_vm7, %v1470_v28, -inf }
 0x475   :  { %v1473_v60 = vmax.f32 %v1472_v35, %v1471_v42 }
 0x476   :  { %v1415_v0 = vrot.slane %v1414_v63, 4 }
 0x477   :  { %v1474_v29 = vrot.slane %v1473_v60, 4 }
 0x478   :  { %v1416_v1 = vmax.f32 %v1414_v63, %v1415_v0 }
 0x479   :  { %v1475_v31 = vmax.f32 %v1473_v60, %v1474_v29 }
 0x47a   :  { %v1417_v3 = vrot.slane %v1416_v1, 2 }
 0x47b   :  { %v1476_v32 = vrot.slane %v1475_v31, 2 }
 0x47c   :  { %v1418_v4 = vmax.f32 %v1416_v1, %v1417_v3 }
 0x47d   :  { %v1477_v36 = vmax.f32 %v1475_v31, %v1476_v32 }
 0x47e   :  { %v1419_v6 = vrot.slane %v1418_v4, 1 }
 0x47f   :  { %v1478_v40 = vrot.slane %v1477_v36, 1 }
 0x480   :  { %v1420_v8 = vmax.f32 %v1418_v4, %v1419_v6 }
 0x481   :  { %v1479_v48 = vmax.f32 %v1477_v36, %v1478_v40 }
 0x482   :  { %2326 = vpush %v1420_v8 }
 0x4b3   :  { %s2327_s19 = spop %2326 }
 0x4b4   :  { %v1422_v10 = vstv %s2327_s19 }
 0x4b5   :  { %v1423_v11 = vsub.f32 %v1400_v56, %v1422_v10  ;;  %v1424_v12 = vsub.f32 %v1410_v59, %v1422_v10  ;;  %v1425_v13 = vsub.f32 -1e+30, %v1422_v10  ;;  %v2479_v10 = vld [vmem:[#allocation24] sm:$0xff]  }
 0x4b6   :  { %2279 = vmatpush3.bf16.msra.mxu1 %v2479_v10 }
 0x4b7   :  { %v1426_v15 = vmul.f32 1.442695, %v1423_v11  ;;  %v1428_v25 = vmul.f32 1.442695, %v1424_v12  ;;  %v1430_v16 = vmul.f32 1.442695, %v1425_v13  ;;  %2280 = vmatprep.subr.bf16.mxu1 %v2927_v5 }
 0x4b8   :  { %v2480_v11 = vld [vmem:[#allocation24 + $0x8] sm:$0xff]   ;;  %v2481_v12 = vld [vmem:[#allocation24 + $0x10] sm:$0xff]   ;;  %v2482_v13 = vld [vmem:[#allocation24 + $0x18] sm:$0xff]  }
 0x4b9   :  { %2503 = vpow2.f32 %v1426_v15  ;;  %v2483_v15 = vld [vmem:[#allocation24 + $0x20] sm:$0xff]  }
 0x4ba   :  { %2505 = vpow2.f32 %v1428_v25  ;;  %2281 = vmatpush3.bf16.msra.mxu1 %v2480_v11  ;;  %v2484_v25 = vld [vmem:[#allocation24 + $0x28] sm:$0xff]  }
 0x4bb   :  { %2507 = vpow2.f32 %v1430_v16  ;;  %2282 = vmatprep.subr.bf16.mxu1 %v2927_v5  ;;  %v2485_v16 = vld [vmem:[#allocation24 + $0x30] sm:$0xff]  }
 0x4be   :  { %2283 = vmatpush3.bf16.msra.mxu1 %v2481_v12 }
 0x4bf   :  { %2284 = vmatprep.subr.bf16.mxu1 %v2927_v5 }
 0x4c2   :  { %2285 = vmatpush3.bf16.msra.mxu1 %v2482_v13 }
 0x4c3   :  { %v3496_v51 = vpop.eup %2503  ;;  %2286 = vmatprep.subr.bf16.mxu1 %v2927_v5 }
 0x4c4   :  { %v3498_v9 = vpop.eup %2505  ;;  %v1433_v18 = vsel %vm1432_vm13, %v3496_v51, 0.0 }
 0x4c5   :  { %v3502_v19 = vpop.eup %2507  ;;  %v1434_v21 = vsel %vm1432_vm13, %v3498_v9, 0.0 }
 0x4c6   :  { %v1435_v23 = vadd.f32 %v1434_v21, %v1433_v18  ;;  %v1437_v43 = vsel %vm1436_vm14, %v3502_v19, 0.0  ;;  %2287 = vmatpush3.bf16.msra.mxu1 %v2483_v15  ;;  %v2486_v18 = vld [vmem:[#allocation24 + $0x38] sm:$0xff]  }
 0x4c7   :  { %2288 = vmatprep.subr.bf16.mxu1 %v2927_v5 }
 0x4c8   :  { %v1438_v24 = vadd.f32 %v1437_v43, %v1435_v23 }
 0x4ca   :  { %1439 = vadd.xlane.f32.xlu1 %v1438_v24  ;;  %2289 = vmatpush3.bf16.msra.mxu1 %v2484_v25 }
 0x4cb   :  { %2290 = vmatprep.subr.bf16.mxu1 %v2927_v5 }
 0x4ce   :  { %2291 = vmatpush3.bf16.msra.mxu1 %v2485_v16 }
 0x4cf   :  { %2292 = vmatprep.subr.bf16.mxu1 %v2927_v5 }
 0x4d2   :  { %2293 = vmatpush3.bf16.msra.mxu1 %v2486_v18 }
 0x557   :  { %v1440_v57 = vpop.xlane.xlu1 %1439 }
 0x558   :  { %v1441_v33 = vrot.slane %v1440_v57, 4 }
 0x55a   :  { %v1442_v34 = vadd.f32 %v1441_v33, %v1440_v57 }
 0x55c   :  { %v1443_v38 = vrot.slane %v1442_v34, 2 }
 0x55e   :  { %v1444_v39 = vadd.f32 %v1443_v38, %v1442_v34 }
 0x560   :  { %v1445_v44 = vrot.slane %v1444_v39, 1 }
 0x562   :  { %v1446_v45 = vadd.f32 %v1445_v44, %v1444_v39 }
 0x564   :  { %2328 = vpush %v1446_v45 }
 0x565   :  { %2330 = vpush %v1479_v48 }
 0x595   :  { %s3511_s5 = spop %2328 }
 0x596   :  { %s2331_s12 = spop %2330  ;;  %v1448_v35 = vstv %s3511_s5 }
 0x597   :  { %v1481_v49 = vstv %s2331_s12 }
 0x598   :  { %v1482_v53 = vsub.f32 -1e+30, %v1481_v49  ;;  %v1483_v55 = vsub.f32 %v1469_v27, %v1481_v49  ;;  %v1484_v56 = vsub.f32 %v1470_v28, %v1481_v49 }
 0x59a   :  { %v1485_v58 = vmul.f32 1.442695, %v1482_v53  ;;  %v1487_v2 = vmul.f32 1.442695, %v1483_v55  ;;  %v1489_v59 = vmul.f32 1.442695, %v1484_v56 }
 0x59c   :  { %2509 = vpow2.f32 %v1485_v58 }
 0x59d   :  { %2511 = vpow2.f32 %v1487_v2 }
 0x59e   :  { %2513 = vpow2.f32 %v1489_v59 }
 0x59f   :  { %2515 = vrcp.f32 %v1448_v35 }
 0x5a6   :  { %v2510_v62 = vpop.eup %2509 }
 0x5a7   :  { %v2512_v63 = vpop.eup %2511  ;;  %v1491_v0 = vsel %vm1432_vm13, %v2510_v62, 0.0 }
 0x5a8   :  { %v2514_v1 = vpop.eup %2513  ;;  %v1492_v3 = vsel %vm1432_vm13, %v2512_v63, 0.0 }
 0x5a9   :  { %v1493_v4 = vadd.f32 %v1492_v3, %v1491_v0  ;;  %v1494_v6 = vsel %vm1436_vm14, %v2514_v1, 0.0  ;;  %v2516_v42 = vpop.eup %2515 }
 0x5aa   :  { %v1450_v60 = vmul.f32 %v2516_v42, %v3496_v51  ;;  %v1451_v29 = vmul.f32 %v2516_v42, %v3498_v9  ;;  %v1452_v31 = vmul.f32 %v2516_v42, %v3502_v19 }
 0x5ab   :  { %v1495_v8 = vadd.f32 %v1494_v6, %v1493_v4 }
 0x5ac   :  { %v1453_v5 = vmul.f32 %v1450_v60, %v3378_v46  ;;  %v1454_v57 = vmul.f32 %v1451_v29, %v3374_v30  ;;  %v1455_v32 = vmul.f32 %v1452_v31, %v3322_v7  ;;  %v1778_v31 = vld [vmem:[%s3689_s4 + $0x8] sm:$0xff] }
 0x5ad   :  { %1496 = vadd.xlane.f32.xlu0 %v1495_v8 }
 0x5ae   :  { %v1456_v34 = vadd.f32 %v1454_v57, %v1453_v5  ;;  %v1457_v36 = vsel %vm427_vm7, %v1455_v32, 0.0  ;;  %v1779_v57 = vld [vmem:[%s3689_s4 + $0x10] sm:$0xf]  ;;  %v1784_v32 = vmul.f32 %v3474_v20, %v1778_v31 }
 0x5b0   :  { %v1458_v38 = vadd.f32 %v1457_v36, %v1456_v34  ;;  %vm1787_vm3 = vcmp.gt.f32.partialorder %v1784_v32, 0.0 }
 0x5b2   :  { %v1459_v39 = vrot.slane %v1458_v38, 4 }
 0x5b4   :  { %v1460_v45 = vadd.f32 %v1459_v39, %v1458_v38 }
 0x5b6   :  { %v1461_v56 = vrot.slane %v1460_v45, 2 }
 0x5b8   :  { %v1462_v59 = vadd.f32 %v1461_v56, %v1460_v45 }
 0x5ba   :  { %v1463_v4 = vrot.slane %v1462_v59, 1 }
 0x63a   :  { %v1497_v21 = vpop.xlane.xlu0 %1496 }
 0x63b   :  { %v1498_v23 = vrot.slane %v1497_v21, 4 }
 0x63d   :  { %v1499_v43 = vadd.f32 %v1498_v23, %v1497_v21 }
 0x63f   :  { %v1500_v24 = vrot.slane %v1499_v43, 2 }
 0x641   :  { %v1501_v26 = vadd.f32 %v1500_v24, %v1499_v43 }
 0x643   :  { %v1502_v27 = vrot.slane %v1501_v26, 1 }
 0x645   :  { %v1503_v28 = vadd.f32 %v1502_v27, %v1501_v26  ;;  %v2110_v27 = vld [vmem:[#allocation25] ss:$0 sm:$0xff] }
 0x647   :  { %2332 = vpush %v1503_v28 }
 0x678   :  { %s2333_s1 = spop %2332 }
 0x679   :  { %v1505_v33 = vstv %s2333_s1 }
 0x67a   :  { %2517 = vrcp.f32 %v1505_v33  ;;  %v1785_v33 = vmul.f32 0.0, %v1779_v57 }
 0x67c   :  { %vm1788_vm4 = vcmp.gt.f32.partialorder %v1785_v33, 0.0 }
 0x684   :  { %v2518_v40 = vpop.eup %2517 }
 0x685   :  { %v1507_v51 = vmul.f32 %v2518_v40, %v2510_v62  ;;  %v1508_v44 = vmul.f32 %v2518_v40, %v2512_v63  ;;  %v1509_v9 = vmul.f32 %v2518_v40, %v2514_v1  ;;  %v1464_v1 = vadd.f32 %v1463_v4, %v1462_v59 }
 0x687   :  { %v1510_v19 = vmul.f32 %v1507_v51, %v3378_v46  ;;  %v1511_v48 = vmul.f32 %v1508_v44, %v3374_v30  ;;  %v1512_v49 = vmul.f32 %v1509_v9, %v3322_v7 }
 0x689   :  { %v1513_v53 = vadd.f32 %v1511_v48, %v1510_v19  ;;  %v1514_v55 = vsel %vm427_vm7, %v1512_v49, 0.0 }
 0x68b   :  { %v1515_v58 = vadd.f32 %v1514_v55, %v1513_v53 }
 0x68d   :  { %v1516_v2 = vrot.slane %v1515_v58, 4 }
 0x68f   :  { %v1517_v0 = vadd.f32 %v1516_v2, %v1515_v58 }
 0x691   :  { %v1518_v3 = vrot.slane %v1517_v0, 2 }
 0x693   :  { %v1519_v62 = vadd.f32 %v1518_v3, %v1517_v0 }
 0x695   :  { %v1520_v63 = vrot.slane %v1519_v62, 1 }
 0x697   :  { %v1521_v6 = vadd.f32 %v1520_v63, %v1519_v62 }
 0x699   :  { %v1522_v46 = vsel %vm460_vm8, %v1464_v1, %v1521_v6 }
 0x69a   :  { %v1523_v8 = vpack.c.bf16 %v1522_v46, %v1522_v46 }
 0x69c   :  { %2295 = vmatmul.mubr.bf16.vlgmr.msra.gmra.mrb[12].mxu1 %v1523_v8 }
 0x76f   :  { %v1622_v30 = vpop.f32.mrb[12].mxu1 }
 0x770   :  { %v1647_v7 = vrot.slane %v1622_v30, %v3435_v14  ;;  %v1750_v10 = vrot.slane %v1622_v30, %v3438_v17  ;;  %v2296_v11 = vpop.f32.mrb[13].mxu1 }
 0x771   :  { %v1625_v12 = vpop.f32.mrb[14].mxu1 }
 0x772   :  { %v1649_v13 = vmul.f32 %v3474_v20, %v1647_v7  ;;  %v1650_v15 = vmul.f32 0.0, %v1647_v7  ;;  %v1734_v25 = vadd.f32 %v3490_v52, %v1647_v7  ;;  %v1751_v16 = vmul.f32 0.0, %v1750_v10  ;;  %v2297_v18 = vpop.f32.mrb[15].mxu1 }
 0x773   :  { %v1752_v21 = vmul.f32 %v3478_v22, %v1750_v10  ;;  %v1753_v24 = vmul.f32 %v3482_v61, %v1750_v10 }
 0x774   :  { %v1742_v23 = vadd.f32 %v3488_v50, %v1650_v15  ;;  %v1737_v43 = vadd.f32 %v3492_v54, %v1649_v13  ;;  %v1754_v14 = vadd.f32 %v1751_v16, %v1734_v25  ;;  %v1777_v54 = vld [vmem:[%s3689_s4] sm:$0xff] }
 0x775   :  { %v1873_v5 = vmul.f32 0.0, %v1777_v54  ;;  %vm1786_vm1 = vcmp.gt.f32.partialorder %v1777_v54, 0.0 }
 0x776   :  { %v1755_v26 = vadd.f32 %v1752_v21, %v1737_v43  ;;  %v1756_v17 = vadd.f32 %v1753_v24, %v1742_v23  ;;  %2519 = vtanh.f32 %v1754_v14  ;;  %v1874_v14 = vmul.f32 %v3478_v22, %v1778_v31 }
 0x777   :  { %vm1876_vm2 = vcmp.gt.f32.partialorder %v1873_v5, 0.0 }
 0x778   :  { %2521 = vtanh.f32 %v1755_v26  ;;  %vm1877_vm5 = vcmp.gt.f32.partialorder %v1874_v14, 0.0  ;;  %v1875_v26 = vmul.f32 %v3482_v61, %v1779_v57 }
 0x779   :  { %2523 = vtanh.f32 %v1756_v17 }
 0x77a   :  { %vm1878_vm6 = vcmp.gt.f32.partialorder %v1875_v26, 0.0 }
 0x780   :  { %v2520_v28 = vpop.eup %2519 }
 0x781   :  { %v1767_v35 = vmul.f32 %v2520_v28, %v2110_v27 }
 0x782   :  { %v2522_v52 = vpop.eup %2521 }
 0x783   :  { %v2524_v42 = vpop.eup %2523  ;;  %1770 = vadd.xlane.f32.xlu1 %v1767_v35  ;;  %v1768_v60 = vmul.f32 %v2522_v52, %v2110_v27 }
 0x784   :  { %v1769_v29 = vmul.f32 %v2524_v42, %v2110_v27 }
 0x785   :  { %1772 = vadd.xlane.f32.xlu0 %v1768_v60 }
 0x786   :  { %v1774_v50 = vsel %vm427_vm7, %v1769_v29, 0.0 }
 0x787   :  { %1775 = vadd.xlane.f32.xlu1 %v1774_v50 }
 0x810   :  { %v1771_v34 = vpop.xlane.xlu1 %1770 }
 0x811   :  { %v1789_v36 = vsel %vm1786_vm1, %v1771_v34, -1e+30  ;;  %v3555_v38 = vsel %vm1876_vm2, %v1771_v34, -1e+30 }
 0x812   :  { %v1773_v39 = vpop.xlane.xlu0 %1772  ;;  %v1792_v51 = vsel %vm1432_vm13, %v1789_v36, -inf  ;;  %v1882_v22 = vsel %vm1432_vm13, %v3555_v38, -inf }
 0x813   :  { %v1790_v40 = vsel %vm1787_vm3, %v1773_v39, -1e+30  ;;  %v3565_v27 = vsel %vm1877_vm5, %v1773_v39, -1e+30 }
 0x814   :  { %v1793_v44 = vsel %vm1432_vm13, %v1790_v40, -inf  ;;  %v1776_v9 = vpop.xlane.xlu1 %1775  ;;  %v1883_v42 = vsel %vm1432_vm13, %v3565_v27, -inf }
 0x815   :  { %v1791_v45 = vsel %vm1788_vm4, %v1776_v9, -1e+30  ;;  %v1795_v19 = vmax.f32 %v1792_v51, %v1793_v44  ;;  %v1881_v50 = vsel %vm1878_vm6, %v1776_v9, -1e+30  ;;  %v1885_v5 = vmax.f32 %v1882_v22, %v1883_v42 }
 0x816   :  { %v1794_v20 = vsel %vm1436_vm14, %v1791_v45, -inf  ;;  %v1884_v57 = vsel %vm1436_vm14, %v1881_v50, -inf  ;;  %v1780_v9 = vcvt.s32.f32 %v3279_v37 }
 0x817   :  { %v1796_v48 = vmax.f32 %v1795_v19, %v1794_v20  ;;  %v1886_v32 = vmax.f32 %v1885_v5, %v1884_v57  ;;  %v1782_v19 = vcvt.s32.f32 %v3282_v41 }
 0x819   :  { %1797 = vmax.xlane.f32.xlu0 %v1796_v48 }
 0x8a6   :  { %v1798_v49 = vpop.xlane.xlu0 %1797 }
 0x8a7   :  { %v1799_v53 = vrot.slane %v1798_v49, 4 }
 0x8a9   :  { %v1800_v55 = vmax.f32 %v1798_v49, %v1799_v53 }
 0x8ab   :  { %v1801_v56 = vrot.slane %v1800_v55, 2 }
 0x8ad   :  { %v1802_v58 = vmax.f32 %v1800_v55, %v1801_v56 }
 0x8af   :  { %v1803_v2 = vrot.slane %v1802_v58, 1 }
 0x8b1   :  { %v1804_v59 = vmax.f32 %v1802_v58, %v1803_v2 }
 0x8b3   :  { %2334 = vpush %v1804_v59 }
 0x8e4   :  { %s2335_s28 = spop %2334 }
 0x8e5   :  { %v1806_v0 = vstv %s2335_s28 }
 0x8e6   :  { %v1807_v3 = vsub.f32 %v1789_v36, %v1806_v0  ;;  %v1808_v4 = vsub.f32 %v1790_v40, %v1806_v0  ;;  %v1809_v62 = vsub.f32 %v1791_v45, %v1806_v0  ;;  %v1781_v45 = vcvt.s32.f32 %v3297_v47 }
 0x8e8   :  { %v1810_v63 = vmul.f32 1.442695, %v1807_v3  ;;  %v1812_v1 = vmul.f32 1.442695, %v1808_v4  ;;  %v1814_v6 = vmul.f32 1.442695, %v1809_v62 }
 0x8ea   :  { %2525 = vpow2.f32 %v1810_v63 }
 0x8eb   :  { %2527 = vpow2.f32 %v1812_v1 }
 0x8ec   :  { %2529 = vpow2.f32 %v1814_v6 }
 0x8f4   :  { %v2526_v46 = vpop.eup %2525 }
 0x8f5   :  { %v2528_v8 = vpop.eup %2527  ;;  %v1816_v30 = vsel %vm1432_vm13, %v2526_v46, 0.0 }
 0x8f6   :  { %v2530_v7 = vpop.eup %2529  ;;  %v1817_v10 = vsel %vm1432_vm13, %v2528_v8, 0.0 }
 0x8f7   :  { %v1818_v11 = vadd.f32 %v1817_v10, %v1816_v30  ;;  %v1819_v12 = vsel %vm1436_vm14, %v2530_v7, 0.0 }
 0x8f9   :  { %v1820_v13 = vadd.f32 %v1819_v12, %v1818_v11 }
 0x8fb   :  { %1821 = vadd.xlane.f32.xlu1 %v1820_v13 }
 0x988   :  { %v1822_v15 = vpop.xlane.xlu1 %1821 }
 0x989   :  { %v1823_v25 = vrot.slane %v1822_v15, 4 }
 0x98b   :  { %v1824_v16 = vadd.f32 %v1823_v25, %v1822_v15 }
 0x98d   :  { %v1825_v18 = vrot.slane %v1824_v16, 2 }
 0x98f   :  { %v1826_v21 = vadd.f32 %v1825_v18, %v1824_v16 }
 0x991   :  { %v1827_v23 = vrot.slane %v1826_v21, 1 }
 0x993   :  { %v1828_v43 = vadd.f32 %v1827_v23, %v1826_v21 }
 0x995   :  { %2336 = vpush %v1828_v43 }
 0x9c6   :  { %s2337_s15 = spop %2336 }
 0x9c7   :  { %v1830_v24 = vstv %s2337_s15 }
 0x9c8   :  { %2531 = vrcp.f32 %v1830_v24 }
 0x9d2   :  { %v2532_v17 = vpop.eup %2531 }
 0x9d3   :  { %v1832_v28 = vmul.f32 %v2532_v17, %v2526_v46  ;;  %v1833_v35 = vmul.f32 %v2532_v17, %v2528_v8  ;;  %v1834_v52 = vmul.f32 %v2532_v17, %v2530_v7 }
 0x9d5   :  { %v1835_v60 = vsel %vm1432_vm13, %v1832_v28, -inf  ;;  %v1836_v29 = vsel %vm1432_vm13, %v1833_v35, -inf  ;;  %v1837_v61 = vsel %vm1436_vm14, %v1834_v52, -inf }
 0x9d6   :  { %v1838_v54 = vmax.f32 %v1835_v60, %v1836_v29 }
 0x9d8   :  { %v1839_v31 = vmax.f32 %v1838_v54, %v1837_v61 }
 0x9da   :  { %1840 = vmax.xlane.f32.xlu0 %v1839_v31 }
 0x9de   :  { %1887 = vmax.xlane.f32.xlu0 %v1886_v32 }
 0xa67   :  { %v1841_v33 = vpop.xlane.xlu0 %1840 }
 0xa68   :  { %v1842_v34 = vrot.slane %v1841_v33, 4 }
 0xa6a   :  { %v1843_v36 = vmax.f32 %v1841_v33, %v1842_v34 }
 0xa6b   :  { %v1888_v0 = vpop.xlane.xlu0 %1887 }
 0xa6c   :  { %v1844_v39 = vrot.slane %v1843_v36, 2  ;;  %v1889_v3 = vrot.slane %v1888_v0, 4 }
 0xa6e   :  { %v1845_v40 = vmax.f32 %v1843_v36, %v1844_v39  ;;  %v1890_v4 = vmax.f32 %v1888_v0, %v1889_v3 }
 0xa70   :  { %v1846_v51 = vrot.slane %v1845_v40, 1  ;;  %v1891_v62 = vrot.slane %v1890_v4, 2 }
 0xa72   :  { %v1847_v44 = vmax.f32 %v1845_v40, %v1846_v51  ;;  %v1892_v46 = vmax.f32 %v1890_v4, %v1891_v62 }
 0xa74   :  { %2338 = vpush %v1847_v44  ;;  %v1893_v7 = vrot.slane %v1892_v46, 1 }
 0xa76   :  { %v1894_v12 = vmax.f32 %v1892_v46, %v1893_v7 }
 0xaa5   :  { %s2339_s26 = spop %2338 }
 0xaa6   :  { %v3578_v20 = vstv %s2339_s26 }
 0xaa7   :  { %vm1850_vm7 = vcmp.ge.f32.partialorder %v1832_v28, %v3578_v20  ;;  %vm1851_vm9 = vcmp.ge.f32.partialorder %v1833_v35, %v3578_v20  ;;  %vm1852_vm10 = vcmp.ge.f32.partialorder %v1834_v52, %v3578_v20 }
 0xaa8   :  { %v1853_v48 = vsel %vm1850_vm7, %v1780_v9, 20.0  ;;  %v1854_v49 = vsel %vm1851_vm9, %v1781_v45, 20.0  ;;  %v1855_v53 = vsel %vm1852_vm10, %v1782_v19, 20.0 }
 0xaa9   :  { %v1856_v55 = vsel %vm1432_vm13, %v1853_v48, inf  ;;  %v1857_v56 = vsel %vm1432_vm13, %v1854_v49, inf  ;;  %v1858_v2 = vsel %vm1436_vm14, %v1855_v53, inf }
 0xaaa   :  { %v1859_v58 = vmin.f32 %v1856_v55, %v1857_v56 }
 0xaac   :  { %v1860_v59 = vmin.f32 %v1859_v58, %v1858_v2 }
 0xaae   :  { %1861 = vmin.xlane.f32.xlu1 %v1860_v59 }
 0xb3b   :  { %v1862_v63 = vpop.xlane.xlu1 %1861 }
 0xb3c   :  { %v1863_v1 = vrot.slane %v1862_v63, 4 }
 0xb3e   :  { %v1864_v6 = vmin.f32 %v1862_v63, %v1863_v1 }
 0xb40   :  { %v1865_v8 = vrot.slane %v1864_v6, 2 }
 0xb42   :  { %v1866_v30 = vmin.f32 %v1864_v6, %v1865_v8 }
 0xb44   :  { %v1867_v10 = vrot.slane %v1866_v30, 1 }
 0xb46   :  { %v1868_v11 = vmin.f32 %v1866_v30, %v1867_v10 }
 0xb48   :  { %2340 = vpush %v1868_v11 }
 0xb49   :  { %2342 = vpush %v1894_v12 }
 0xb79   :  { %s3592_s27 = spop %2340 }
 0xb7a   :  { %s2343_s8 = spop %2342 }
 0xb7b   :  { %v1896_v13 = vstv %s2343_s8 }
 0xb7c   :  { %v1897_v15 = vsub.f32 %v3555_v38, %v1896_v13  ;;  %v1898_v25 = vsub.f32 %v3565_v27, %v1896_v13  ;;  %v1899_v16 = vsub.f32 %v1881_v50, %v1896_v13 }
 0xb7e   :  { %v1900_v18 = vmul.f32 1.442695, %v1897_v15  ;;  %v1902_v21 = vmul.f32 1.442695, %v1898_v25  ;;  %v1904_v23 = vmul.f32 1.442695, %v1899_v16 }
 0xb80   :  { %2533 = vpow2.f32 %v1900_v18 }
 0xb81   :  { %2535 = vpow2.f32 %v1902_v21 }
 0xb82   :  { %2537 = vpow2.f32 %v1904_v23 }
 0xb8a   :  { %v2534_v43 = vpop.eup %2533 }
 0xb8b   :  { %v2536_v24 = vpop.eup %2535  ;;  %v1906_v14 = vsel %vm1432_vm13, %v2534_v43, 0.0 }
 0xb8c   :  { %v2538_v26 = vpop.eup %2537  ;;  %v1907_v17 = vsel %vm1432_vm13, %v2536_v24, 0.0 }
 0xb8d   :  { %v1908_v28 = vadd.f32 %v1907_v17, %v1906_v14  ;;  %v1909_v35 = vsel %vm1436_vm14, %v2538_v26, 0.0 }
 0xb8f   :  { %v1910_v38 = vadd.f32 %v1909_v35, %v1908_v28 }
 0xb91   :  { %1911 = vadd.xlane.f32.xlu1 %v1910_v38 }
 0xc1e   :  { %v1912_v27 = vpop.xlane.xlu1 %1911 }
 0xc1f   :  { %v1913_v52 = vrot.slane %v1912_v27, 4 }
 0xc21   :  { %v1914_v42 = vadd.f32 %v1913_v52, %v1912_v27 }
 0xc23   :  { %v1915_v60 = vrot.slane %v1914_v42, 2 }
 0xc25   :  { %v1916_v29 = vadd.f32 %v1915_v60, %v1914_v42 }
 0xc27   :  { %v1917_v50 = vrot.slane %v1916_v29, 1 }
 0xc29   :  { %v1918_v54 = vadd.f32 %v1917_v50, %v1916_v29 }
 0xc2b   :  { %2344 = vpush %v1918_v54 }
 0xc5c   :  { %s2345_s7 = spop %2344 }
 0xc5d   :  { %v1920_v22 = vstv %s2345_s7 }
 0xc5e   :  { %2539 = vrcp.f32 %v1920_v22 }
 0xc5f   :  { %2541 = vlog2.f32 %v3578_v20 }
 0xc68   :  { %v2540_v61 = vpop.eup %2539 }
 0xc69   :  { %v1922_v31 = vmul.f32 %v2540_v61, %v2534_v43  ;;  %v1923_v5 = vmul.f32 %v2540_v61, %v2536_v24  ;;  %v1924_v57 = vmul.f32 %v2540_v61, %v2538_v26  ;;  %v2542_v63 = vpop.eup %2541 }
 0xc6a   :  { %v1872_v6 = vmul.f32 0.6931472, %v2542_v63 }
 0xc6b   :  { %v1925_v32 = vsel %vm1432_vm13, %v1922_v31, -inf  ;;  %v1926_v33 = vsel %vm1432_vm13, %v1923_v5, -inf  ;;  %v1927_v36 = vsel %vm1436_vm14, %v1924_v57, -inf }
 0xc6c   :  { %v1928_v34 = vmax.f32 %v1925_v32, %v1926_v33 }
 0xc6e   :  { %v1929_v39 = vmax.f32 %v1928_v34, %v1927_v36 }
 0xc70   :  { %1930 = vmax.xlane.f32.xlu0 %v1929_v39 }
 0xcfd   :  { %v1931_v40 = vpop.xlane.xlu0 %1930 }
 0xcfe   :  { %v1932_v51 = vrot.slane %v1931_v40, 4 }
 0xd00   :  { %v1933_v44 = vmax.f32 %v1931_v40, %v1932_v51 }
 0xd02   :  { %v1934_v48 = vrot.slane %v1933_v44, 2 }
 0xd04   :  { %v1935_v49 = vmax.f32 %v1933_v44, %v1934_v48 }
 0xd06   :  { %v1936_v53 = vrot.slane %v1935_v49, 1 }
 0xd08   :  { %v1937_v55 = vmax.f32 %v1935_v49, %v1936_v53 }
 0xd0a   :  { %2346 = vpush %v1937_v55 }
 0xd3b   :  { %s2347_s14 = spop %2346 }
 0xd3c   :  { %v1939_v56 = vstv %s2347_s14 }
 0xd3d   :  { %vm1940_vm11 = vcmp.ge.f32.partialorder %v1922_v31, %v1939_v56  ;;  %vm1941_vm12 = vcmp.ge.f32.partialorder %v1923_v5, %v1939_v56  ;;  %2543 = vlog2.f32 %v1939_v56  ;;  %vm1942_vm15 = vcmp.ge.f32.partialorder %v1924_v57, %v1939_v56 }
 0xd3e   :  { %v1943_v58 = vsel %vm1940_vm11, %v1780_v9, 20.0  ;;  %v1944_v2 = vsel %vm1941_vm12, %v1781_v45, 20.0  ;;  %v1945_v59 = vsel %vm1942_vm15, %v1782_v19, 20.0 }
 0xd3f   :  { %v1946_v0 = vsel %vm1432_vm13, %v1943_v58, inf  ;;  %v1947_v3 = vsel %vm1432_vm13, %v1944_v2, inf  ;;  %v1948_v4 = vsel %vm1436_vm14, %v1945_v59, inf }
 0xd40   :  { %v1949_v20 = vmin.f32 %v1946_v0, %v1947_v3 }
 0xd42   :  { %v1950_v62 = vmin.f32 %v1949_v20, %v1948_v4 }
 0xd44   :  { %1951 = vmin.xlane.f32.xlu1 %v1950_v62 }
 0xd47   :  { %v2544_v1 = vpop.eup %2543 }
 0xd48   :  { %v1963_v37 = vmul.f32 0.6931472, %v2544_v1 }
 0xd4a   :  { %v1967_v47 = vsel %vm460_vm8, %v1872_v6, %v1963_v37 }
 0xd4b   :  { %1968 = vst.msk [vmem:[%s3658_s23] sm:$0x3] %vm1965_vm0, %v1967_v47 }
 0xd4c   :  { %2876 = shalt.err (!%p2873_p9)
}
 0xd4d   :  { %s2877_s25 = scalar_lea.hbm %s3659_s24, 32 }
 0xd4e   :  { %p2878_p10 = scmp.ne.s32.totalorder %s3659_s24, %s2877_s25  ;;  %p2881_p11 = scmp.lt.u32.totalorder %s2877_s25, %s3659_s24 }
 0xd50   :  { %p2883_p12 = pnand %p2881_p11, %p2878_p10 }
 0xd52   :  { %2886 = shalt.err (!%p2883_p12)
}
 0xd53   :  { %1982 = dma.vmem_to_hbm [thread:$0]  %s1980_s13, 32, %s3659_s24, [#allocation4]   ;;  %v1870_v11 = vstv %s3592_s27 }
 0xdd1   :  { %v1952_v41 = vpop.xlane.xlu1 %1951 }
 0xdd2   :  { %v1953_v9 = vrot.slane %v1952_v41, 4 }
 0xdd4   :  { %v1954_v45 = vmin.f32 %v1952_v41, %v1953_v9 }
 0xdd6   :  { %v1955_v19 = vrot.slane %v1954_v45, 2 }
 0xdd8   :  { %v1956_v46 = vmin.f32 %v1954_v45, %v1955_v19 }
 0xdda   :  { %v1957_v8 = vrot.slane %v1956_v46, 1 }
 0xddc   :  { %v1958_v30 = vmin.f32 %v1956_v46, %v1957_v8 }
 0xdde   :  { %2348 = vpush %v1958_v30 }
 0xe0f   :  { %s2349_s1 = spop %2348 }
 0xe10   :  { %v1960_v7 = vstv %s2349_s1 }
 0xe11   :  { %v2111_v10 = vadd.f32 -10.0, %v1960_v7 }
 0xe13   :  { %v1964_v12 = vsel %vm460_vm8, %v1870_v11, %v2111_v10 }
 0xe14   :  { %1966 = vst.msk [vmem:[%s3657_s22] sm:$0x3] %vm1965_vm0, %v1964_v12 }
 0xe15   :  { %2905 = dma.done.wait [#allocation4], 32  }
 0xe16   :  { %2906 = vsyncadd [#allocation4], 4294967264 }
 0xe17   :  { %1990 = vsyncpa [#allocation3], 1 }
 0xe18   :  { %1991 = vsyncpa [#allocation8], 1 }
 0xe19   :  { %1992 = vsyncpa [#allocation11], 1 }
 0xe1a   :  { %1993 = vsyncpa [#allocation14], 1 }
 0xe1b   :  { %1994 = vsyncpa [#allocation17], 1 }
 0xe1c   :  { %1995 = vsyncpa [#allocation20], 1 }
 0xe1d   :  { %1996 = vsyncpa [#allocation23], 1 }
 0xe1e   :  { %1997 = vsyncpa [#allocation26], 1 }
 0xe1f   :  { %1998 = vsyncpa [#allocation4], 1 }
 0xe20   :  { %1999 = vsyncpa [#allocation5], 1 }

</bundles_post_ra>
